<compile_context>
chip_gen: v6e
topology: v6e:2x2x1
jax: 0.10.0
libtpu: 0.0.40
codegen_flags: <defaults>
</compile_context>

<pallas_src>
import functools

import jax
import jax.numpy as jnp
import numpy as np
from jax import lax
from jax.experimental import pallas as pl
from jax.experimental.pallas import tpu as pltpu


def _round_up(n, m):
    return ((n + m - 1) // m) * m


def _pick_strip(h, max_rows):
    """Largest divisor of h that is <= max_rows (keeps strips uniform)."""
    th = max(1, min(h, max_rows))
    while h % th:
        th -= 1
    return th


def _conv3x3_dy_acc(src, w_ref, out_rows, out_w, cin):
    """3x3 conv as 3 accumulated MXU matmuls (one per dy), K = 3*cin.

    src:   (out_rows+2, out_w+2, cin) bf16, spatially padded value.
    w_ref: (9*cin, cout) bf16 ref, rows in (dy, dx, cin) order.
    returns (out_rows*out_w, cout) f32.
    """
    acc = None
    for dy in range(3):
        sl = src[dy:dy + out_rows]                              # (rows, out_w+2, cin)
        patch = jnp.concatenate(
            [sl[:, dx:dx + out_w, :] for dx in range(3)], axis=-1)  # (rows, out_w, 3*cin)
        wk = w_ref[3 * cin * dy:3 * cin * (dy + 1), :]          # (3*cin, cout)
        p = jnp.dot(patch.reshape(out_rows * out_w, 3 * cin), wk,
                    preferred_element_type=jnp.float32)
        acc = p if acc is None else acc + p
    return acc


def _double_conv_kernel(x1_ref, w1_ref, b1_ref, w2_ref, b2_ref, o_ref, *,
                        H, TH, W, Co, conv1_gathered, cin1):
    # x1_ref: (1, 1, rows_in, cols_in, K) bf16 conv1-input strip (with halo)
    # w1_ref: (K1, Co) or (9*Ci, Co) bf16, BN1 scale folded in
    # b1_ref: (1, Co) f32 folded BN1 shift (incl. conv bias)
    # w2_ref: (9*Co, Co) bf16, BN2 scale folded in
    # b2_ref: (1, Co) f32
    # o_ref:  (1, TH, W, Co) bf16 output strip
    s = pl.program_id(1)
    rows1 = TH + 2                      # h1 rows needed by conv2 (1-row halo)

    x1 = x1_ref[0, 0]

    # ---- conv1 (BN scale folded into w1) ----
    if conv1_gathered:
        # wrapper already did the 3x3 gather: one matmul, K = x1.shape[-1]
        acc1 = jnp.dot(x1.reshape(rows1 * W, x1.shape[-1]), w1_ref[...],
                       preferred_element_type=jnp.float32)
    else:
        acc1 = _conv3x3_dy_acc(x1, w1_ref, rows1, W, cin1)

    h1 = jnp.maximum(acc1 + b1_ref[0], 0.0).reshape(rows1, W, Co)   # f32

    # h1 rows outside the image are conv2's zero padding, not conv1 evaluated
    # outside the image -> zero them (only the first/last strip is affected).
    row_img = (s * TH - 1) + lax.broadcasted_iota(jnp.int32, (rows1, 1, 1), 0)
    valid = ((row_img >= 0) & (row_img < H)).astype(jnp.float32)
    h1 = h1 * valid

    # conv2 column zero-padding (image cols -1 and W); bf16 for the MXU.
    zcol = jnp.zeros((rows1, 1, Co), jnp.bfloat16)
    h1p = jnp.concatenate([zcol, h1.astype(jnp.bfloat16), zcol], axis=1)

    # ---- conv2 (BN scale folded into w2) ----
    acc2 = _conv3x3_dy_acc(h1p, w2_ref, TH, W, Co)
    out = jnp.maximum(acc2 + b2_ref[0], 0.0).reshape(TH, W, Co)
    o_ref[0] = out.astype(o_ref.dtype)                              # lane-dense store


def double_conv(x_nchw, params, *, strip_rows=32):
    """Runs DoubleConv.forward. Input/output are NCHW (PyTorch convention)."""
    w1f, b1, w2f, b2, in_ch, out_ch, conv1_gathered = params
    N, Cin, H, W = x_nchw.shape
    assert Cin == in_ch
    Co = w1f.shape[1]
    TH = _pick_strip(H, strip_rows)
    S = H // TH

    x = jnp.transpose(x_nchw, (0, 2, 3, 1))                     # NHWC

    if conv1_gathered:
        # 3x3 gather for conv1 in the wrapper: (N,H,W,9*Cin) padded to K1 lanes.
        K1 = w1f.shape[0]
        xp = jnp.pad(x, ((0, 0), (1, 1), (1, 1), (0, 0)))
        cols = [xp[:, dy:dy + H, dx:dx + W, :]
                for dy in range(3) for dx in range(3)]
        x1 = jnp.concatenate(cols, axis=-1)                     # (N,H,W,9*Cin)
        # 1-row halo space (top/bottom) + lane pad to K1, bf16.
        x1 = jnp.pad(x1, ((0, 0), (1, 1), (0, 0), (0, K1 - 9 * Cin)))
        halo, wx, kx = 2, W, K1
    else:
        # generic path: channel-pad Cin, 2-row + 1-col spatial halo.
        Ci = w1f.shape[0] // 9
        x1 = jnp.pad(x, ((0, 0), (2, 2), (1, 1), (0, Ci - Cin)))
        halo, wx, kx = 4, W + 2, Ci
    x1 = x1.astype(jnp.bfloat16)

    # Materialise overlapping row strips so BlockSpec blocks stay disjoint
    # (strip s holds its TH output rows plus the halo rows conv1/conv2 need).
    x1s = jnp.stack([x1[:, s * TH:s * TH + TH + halo] for s in range(S)], axis=1)
    # -> (N, S, TH+halo, wx, kx)

    kernel = functools.partial(
        _double_conv_kernel, H=H, TH=TH, W=W, Co=Co,
        conv1_gathered=conv1_gathered, cin1=kx)

    # per-generation VMEM limit: generous on v5e/v6e (128 MiB physical),
    # conservative on v7x (64 MiB physical).
    try:
        vmem_cap = getattr(pltpu.get_tpu_info(), "vmem_capacity_bytes",
                           64 * 1024 * 1024)
    except Exception:
        vmem_cap = 64 * 1024 * 1024
    vmem_limit = (96 if vmem_cap >= (100 << 20) else 40) << 20

    out_nhwc = pl.pallas_call(
        kernel,
        out_shape=jax.ShapeDtypeStruct((N, H, W, Co), jnp.bfloat16),
        grid=(N, S),
        in_specs=[
            pl.BlockSpec((1, 1, TH + halo, wx, kx), lambda n, s: (n, s, 0, 0, 0)),
            pl.BlockSpec(w1f.shape, lambda n, s: (0, 0)),
            pl.BlockSpec((1, Co), lambda n, s: (0, 0)),
            pl.BlockSpec(w2f.shape, lambda n, s: (0, 0)),
            pl.BlockSpec((1, Co), lambda n, s: (0, 0)),
        ],
        out_specs=pl.BlockSpec((1, TH, W, Co), lambda n, s: (n, s, 0, 0)),
        compiler_params=pltpu.CompilerParams(
            dimension_semantics=("parallel", "parallel"),
            vmem_limit_bytes=vmem_limit,
        ),
    )(x1s, w1f, b1, w2f, b2)

    out_nhwc = out_nhwc[..., :out_ch]                           # drop channel pad
    return jnp.transpose(out_nhwc, (0, 3, 1, 2)).astype(jnp.float32)  # NCHW f32


def make_params(key, in_ch, out_ch, eps=1e-5):
    """Deterministic params for both Conv+BN blocks; BN folded into (w, bias)."""
    ks = jax.random.split(key, 12)

    def conv_init(kw, kb, cin, cout):
        bound = 1.0 / np.sqrt(cin * 9)
        w = jax.random.uniform(kw, (cout, cin, 3, 3), jnp.float32, -bound, bound)
        b = jax.random.uniform(kb, (cout,), jnp.float32, -bound, bound)
        return w, b

    def bn_init(kg, kb, km, kv, c):
        gamma = 1.0 + 0.1 * jax.random.normal(kg, (c,), jnp.float32)
        beta = 0.1 * jax.random.normal(kb, (c,), jnp.float32)
        mean = 0.1 * jax.random.normal(km, (c,), jnp.float32)
        var = jax.random.uniform(kv, (c,), jnp.float32, 0.5, 1.5)
        return gamma, beta, mean, var

    w1_oihw, cb1 = conv_init(ks[0], ks[1], in_ch, out_ch)
    g1, be1, m1, v1 = bn_init(ks[2], ks[3], ks[4], ks[5], out_ch)
    w2_oihw, cb2 = conv_init(ks[6], ks[7], out_ch, out_ch)
    g2, be2, m2, v2 = bn_init(ks[8], ks[9], ks[10], ks[11], out_ch)

    # fold BN (eval mode) with conv bias: y = s*(Wx) + (beta - mean*s + cb*s)
    s1 = g1 / jnp.sqrt(v1 + eps)
    bias1 = be1 - m1 * s1 + cb1 * s1
    s2 = g2 / jnp.sqrt(v2 + eps)
    bias2 = be2 - m2 * s2 + cb2 * s2

    Co = _round_up(out_ch, 128)
    conv1_gathered = (9 * in_ch <= 128)      # small-Cin: gather taps in wrapper

    def flat_w(w_oihw, scale, cin_pad, cout_pad):
        # (Cout,Cin,3,3) -> (3,3,Cin,Cout), fold BN scale into Cout columns,
        # zero-pad channels, flatten to (9*cin_pad, cout_pad) (dy,dx,cin) rows.
        w = jnp.transpose(w_oihw, (2, 3, 1, 0)) * scale[None, None, None, :]
        cin, cout = w.shape[2], w.shape[3]
        w = jnp.pad(w, ((0, 0), (0, 0), (0, cin_pad - cin), (0, cout_pad - cout)))
        return w.reshape(9 * cin_pad, cout_pad).astype(jnp.bfloat16)

    if conv1_gathered:
        K1 = _round_up(9 * in_ch, 128)
        w1 = jnp.transpose(w1_oihw, (2, 3, 1, 0)) * s1[None, None, None, :]
        w1 = w1.reshape(9 * in_ch, out_ch)
        w1f = jnp.pad(w1, ((0, K1 - 9 * in_ch), (0, Co - out_ch))).astype(jnp.bfloat16)
    else:
        Ci = _round_up(in_ch, 128)
        w1f = flat_w(w1_oihw, s1, Ci, Co)
    w2f = flat_w(w2_oihw, s2, Co, Co)

    def prep_b(v, cp):
        return jnp.pad(v, (0, cp - v.shape[0])).reshape(1, cp).astype(jnp.float32)

    params = (w1f, prep_b(bias1, Co), w2f, prep_b(bias2, Co),
              in_ch, out_ch, conv1_gathered)
    raw = (w1_oihw, cb1, g1, be1, m1, v1, w2_oihw, cb2, g2, be2, m2, v2)
    return params, raw


def reference(x_nchw, raw, eps=1e-5):
    """Pure-JAX f32 reference (conv -> BN(eval) -> ReLU, twice), NCHW."""
    (w1, cb1, g1, be1, m1, v1, w2, cb2, g2, be2, m2, v2) = raw

    def block(x, w, cb, g, be, m, v):
        y = lax.conv_general_dilated(
            x, w, window_strides=(1, 1), padding=((1, 1), (1, 1)),
            dimension_numbers=("NCHW", "OIHW", "NCHW"))
        y = y + cb[None, :, None, None]
        y = (y - m[None, :, None, None]) / jnp.sqrt(v[None, :, None, None] + eps)
        y = y * g[None, :, None, None] + be[None, :, None, None]
        return jnp.maximum(y, 0.0)

    x = block(x_nchw, w1, cb1, g1, be1, m1, v1)
    x = block(x, w2, cb2, g2, be2, m2, v2)
    return x


if __name__ == "__main__":
    key = jax.random.PRNGKey(0)
    k_x, k_p = jax.random.split(key)

    N, Cin, Cout, H, W = 2, 4, 8, 16, 16
    x = jax.random.normal(k_x, (N, Cin, H, W), jnp.float32)
    params, raw = make_params(k_p, Cin, Cout)

    # strip_rows=8 -> 2 strips of 8 rows each, exercising the strip/halo path.
    out = jax.block_until_ready(double_conv(x, params, strip_rows=8))
    ref = jax.block_until_ready(reference(x, raw))

    assert out.shape == (N, Cout, H, W), out.shape
    # bf16 matmul inputs / intermediate / output (f32 accumulation) vs f32 ref.
    np.testing.assert_allclose(np.asarray(out), np.asarray(ref),
                               rtol=5e-2, atol=5e-2)
    print("KERNEL_OK")
</pallas_src>

<mosaic_0001>
module attributes {stable_mosaic.version = 11 : i64} {
  func.func @_double_conv_kernel(%arg0: i32, %arg1: i32, %arg2: memref<1x1x10x16x128xbf16, #tpu.memory_space<vmem>>, %arg3: memref<128x128xbf16, #tpu.memory_space<vmem>>, %arg4: memref<1x128xf32, #tpu.memory_space<vmem>>, %arg5: memref<1152x128xbf16, #tpu.memory_space<vmem>>, %arg6: memref<1x128xf32, #tpu.memory_space<vmem>>, %arg7: memref<1x8x16x128xbf16, #tpu.memory_space<vmem>>) attributes {dimension_semantics = [#tpu.dimension_semantics<parallel>, #tpu.dimension_semantics<parallel>], iteration_bounds = array<i64: 2, 2>, scalar_prefetch = 0 : i64, scratch_operands = 0 : i64, tpu.core_type = #tpu.core_type<tc>, window_params = [{transform_indices = @transform_0, window_bounds = array<i64: 1, 1, 10, 16, 128>}, {pipeline_mode = #tpu.pipeline_mode<synchronous>, transform_indices = @transform_1, window_bounds = array<i64: 128, 128>}, {pipeline_mode = #tpu.pipeline_mode<synchronous>, transform_indices = @transform_2, window_bounds = array<i64: 1, 128>}, {pipeline_mode = #tpu.pipeline_mode<synchronous>, transform_indices = @transform_3, window_bounds = array<i64: 1152, 128>}, {pipeline_mode = #tpu.pipeline_mode<synchronous>, transform_indices = @transform_4, window_bounds = array<i64: 1, 128>}, {transform_indices = @transform_5, window_bounds = array<i64: 1, 8, 16, 128>}]} {
    %c0 = arith.constant 0 : index
    %c0_0 = arith.constant 0 : index
    %c0_1 = arith.constant 0 : index
    %c0_2 = arith.constant 0 : index
    %c0_3 = arith.constant 0 : index
    %0 = vector.load %arg2[%c0, %c0_0, %c0_1, %c0_2, %c0_3] : memref<1x1x10x16x128xbf16, #tpu.memory_space<vmem>>, vector<1x1x10x16x128xbf16>
    %1 = vector.shape_cast %0 : vector<1x1x10x16x128xbf16> to vector<10x16x128xbf16>
    %2 = vector.shape_cast %1 : vector<10x16x128xbf16> to vector<160x128xbf16>
    %c0_4 = arith.constant 0 : index
    %c0_5 = arith.constant 0 : index
    %3 = vector.load %arg3[%c0_4, %c0_5] : memref<128x128xbf16, #tpu.memory_space<vmem>>, vector<128x128xbf16>
    %cst = arith.constant dense<0.000000e+00> : vector<160x128xf32>
    %4 = tpu.matmul %2, %3, %cst {dimension_numbers = #tpu.dot_dimension_numbers<[1], [0], [0], [1], [0, 0, 1, 1], [], []>} : vector<160x128xbf16>, vector<128x128xbf16>, vector<160x128xf32> -> vector<160x128xf32>
    %c0_6 = arith.constant 0 : index
    %c0_7 = arith.constant 0 : index
    %5 = vector.load %arg4[%c0_6, %c0_7] : memref<1x128xf32, #tpu.memory_space<vmem>>, vector<1x128xf32>
    %6 = vector.shape_cast %5 : vector<1x128xf32> to vector<128xf32>
    %7 = vector.shape_cast %6 : vector<128xf32> to vector<1x128xf32>
    %8 = vector.broadcast %7 : vector<1x128xf32> to vector<160x128xf32>
    %9 = arith.addf %4, %8 : vector<160x128xf32>
    %cst_8 = arith.constant 0.000000e+00 : f32
    %10 = vector.broadcast %cst_8 : f32 to vector<160x128xf32>
    %11 = arith.maximumf %9, %10 : vector<160x128xf32>
    %12 = vector.shape_cast %11 : vector<160x128xf32> to vector<10x16x128xf32>
    %c8_i32 = arith.constant 8 : i32
    %13 = arith.muli %arg1, %c8_i32 : i32
    %c1_i32 = arith.constant 1 : i32
    %14 = arith.subi %13, %c1_i32 : i32
    %15 = tpu.iota {dimensions = array<i32: 0>} : vector<10x1x1xi32>
    %16 = vector.broadcast %14 : i32 to vector<10x1x1xi32>
    %17 = arith.addi %16, %15 : vector<10x1x1xi32>
    %c0_i32 = arith.constant 0 : i32
    %18 = vector.broadcast %c0_i32 : i32 to vector<10x1x1xi32>
    %19 = arith.cmpi sge, %17, %18 : vector<10x1x1xi32>
    %c16_i32 = arith.constant 16 : i32
    %20 = vector.broadcast %c16_i32 : i32 to vector<10x1x1xi32>
    %21 = arith.cmpi slt, %17, %20 : vector<10x1x1xi32>
    %22 = arith.andi %19, %21 : vector<10x1x1xi1>
    %23 = arith.extui %22 : vector<10x1x1xi1> to vector<10x1x1xi32>
    %24 = arith.sitofp %23 : vector<10x1x1xi32> to vector<10x1x1xf32>
    %25 = vector.broadcast %24 : vector<10x1x1xf32> to vector<10x16x128xf32>
    %26 = arith.mulf %12, %25 : vector<10x16x128xf32>
    %cst_9 = arith.constant 0.000000e+00 : bf16
    %27 = vector.broadcast %cst_9 : bf16 to vector<10x1x128xbf16>
    %28 = arith.truncf %26 : vector<10x16x128xf32> to vector<10x16x128xbf16>
    %29 = tpu.concatenate %27, %28, %27 in 1 : vector<10x1x128xbf16>, vector<10x16x128xbf16>, vector<10x1x128xbf16> -> vector<10x18x128xbf16>
    %30 = vector.extract_strided_slice %29 {offsets = [0, 0, 0], sizes = [8, 18, 128], strides = [1, 1, 1]} : vector<10x18x128xbf16> to vector<8x18x128xbf16>
    %31 = vector.extract_strided_slice %30 {offsets = [0, 0, 0], sizes = [8, 16, 128], strides = [1, 1, 1]} : vector<8x18x128xbf16> to vector<8x16x128xbf16>
    %32 = vector.extract_strided_slice %30 {offsets = [0, 1, 0], sizes = [8, 16, 128], strides = [1, 1, 1]} : vector<8x18x128xbf16> to vector<8x16x128xbf16>
    %33 = vector.extract_strided_slice %30 {offsets = [0, 2, 0], sizes = [8, 16, 128], strides = [1, 1, 1]} : vector<8x18x128xbf16> to vector<8x16x128xbf16>
    %34 = tpu.concatenate %31, %32, %33 in 2 : vector<8x16x128xbf16>, vector<8x16x128xbf16>, vector<8x16x128xbf16> -> vector<8x16x384xbf16>
    %c0_10 = arith.constant 0 : index
    %c0_11 = arith.constant 0 : index
    %35 = vector.load %arg5[%c0_10, %c0_11] : memref<1152x128xbf16, #tpu.memory_space<vmem>>, vector<384x128xbf16>
    %36 = vector.shape_cast %34 : vector<8x16x384xbf16> to vector<128x384xbf16>
    %cst_12 = arith.constant dense<0.000000e+00> : vector<128x128xf32>
    %37 = tpu.matmul %36, %35, %cst_12 {dimension_numbers = #tpu.dot_dimension_numbers<[1], [0], [0], [1], [0, 0, 1, 1], [], []>} : vector<128x384xbf16>, vector<384x128xbf16>, vector<128x128xf32> -> vector<128x128xf32>
    %38 = vector.extract_strided_slice %29 {offsets = [1, 0, 0], sizes = [8, 18, 128], strides = [1, 1, 1]} : vector<10x18x128xbf16> to vector<8x18x128xbf16>
    %39 = vector.extract_strided_slice %38 {offsets = [0, 0, 0], sizes = [8, 16, 128], strides = [1, 1, 1]} : vector<8x18x128xbf16> to vector<8x16x128xbf16>
    %40 = vector.extract_strided_slice %38 {offsets = [0, 1, 0], sizes = [8, 16, 128], strides = [1, 1, 1]} : vector<8x18x128xbf16> to vector<8x16x128xbf16>
    %41 = vector.extract_strided_slice %38 {offsets = [0, 2, 0], sizes = [8, 16, 128], strides = [1, 1, 1]} : vector<8x18x128xbf16> to vector<8x16x128xbf16>
    %42 = tpu.concatenate %39, %40, %41 in 2 : vector<8x16x128xbf16>, vector<8x16x128xbf16>, vector<8x16x128xbf16> -> vector<8x16x384xbf16>
    %c384 = arith.constant 384 : index
    %c0_13 = arith.constant 0 : index
    %43 = vector.load %arg5[%c384, %c0_13] : memref<1152x128xbf16, #tpu.memory_space<vmem>>, vector<384x128xbf16>
    %44 = vector.shape_cast %42 : vector<8x16x384xbf16> to vector<128x384xbf16>
    %cst_14 = arith.constant dense<0.000000e+00> : vector<128x128xf32>
    %45 = tpu.matmul %44, %43, %cst_14 {dimension_numbers = #tpu.dot_dimension_numbers<[1], [0], [0], [1], [0, 0, 1, 1], [], []>} : vector<128x384xbf16>, vector<384x128xbf16>, vector<128x128xf32> -> vector<128x128xf32>
    %46 = arith.addf %37, %45 : vector<128x128xf32>
    %47 = vector.extract_strided_slice %29 {offsets = [2, 0, 0], sizes = [8, 18, 128], strides = [1, 1, 1]} : vector<10x18x128xbf16> to vector<8x18x128xbf16>
    %48 = vector.extract_strided_slice %47 {offsets = [0, 0, 0], sizes = [8, 16, 128], strides = [1, 1, 1]} : vector<8x18x128xbf16> to vector<8x16x128xbf16>
    %49 = vector.extract_strided_slice %47 {offsets = [0, 1, 0], sizes = [8, 16, 128], strides = [1, 1, 1]} : vector<8x18x128xbf16> to vector<8x16x128xbf16>
    %50 = vector.extract_strided_slice %47 {offsets = [0, 2, 0], sizes = [8, 16, 128], strides = [1, 1, 1]} : vector<8x18x128xbf16> to vector<8x16x128xbf16>
    %51 = tpu.concatenate %48, %49, %50 in 2 : vector<8x16x128xbf16>, vector<8x16x128xbf16>, vector<8x16x128xbf16> -> vector<8x16x384xbf16>
    %c768 = arith.constant 768 : index
    %c0_15 = arith.constant 0 : index
    %52 = vector.load %arg5[%c768, %c0_15] : memref<1152x128xbf16, #tpu.memory_space<vmem>>, vector<384x128xbf16>
    %53 = vector.shape_cast %51 : vector<8x16x384xbf16> to vector<128x384xbf16>
    %cst_16 = arith.constant dense<0.000000e+00> : vector<128x128xf32>
    %54 = tpu.matmul %53, %52, %cst_16 {dimension_numbers = #tpu.dot_dimension_numbers<[1], [0], [0], [1], [0, 0, 1, 1], [], []>} : vector<128x384xbf16>, vector<384x128xbf16>, vector<128x128xf32> -> vector<128x128xf32>
    %55 = arith.addf %46, %54 : vector<128x128xf32>
    %c0_17 = arith.constant 0 : index
    %c0_18 = arith.constant 0 : index
    %56 = vector.load %arg6[%c0_17, %c0_18] : memref<1x128xf32, #tpu.memory_space<vmem>>, vector<1x128xf32>
    %57 = vector.shape_cast %56 : vector<1x128xf32> to vector<128xf32>
    %58 = vector.shape_cast %57 : vector<128xf32> to vector<1x128xf32>
    %59 = vector.broadcast %58 : vector<1x128xf32> to vector<128x128xf32>
    %60 = arith.addf %55, %59 : vector<128x128xf32>
    %cst_19 = arith.constant 0.000000e+00 : f32
    %61 = vector.broadcast %cst_19 : f32 to vector<128x128xf32>
    %62 = arith.maximumf %60, %61 : vector<128x128xf32>
    %63 = vector.shape_cast %62 : vector<128x128xf32> to vector<8x16x128xf32>
    %64 = arith.truncf %63 : vector<8x16x128xf32> to vector<8x16x128xbf16>
    %c0_20 = arith.constant 0 : index
    %c0_21 = arith.constant 0 : index
    %c0_22 = arith.constant 0 : index
    %c0_23 = arith.constant 0 : index
    %65 = vector.load %arg7[%c0_20, %c0_21, %c0_22, %c0_23] : memref<1x8x16x128xbf16, #tpu.memory_space<vmem>>, vector<1x8x16x128xbf16>
    %66 = vector.shape_cast %65 : vector<1x8x16x128xbf16> to vector<8x16x128xbf16>
    %67 = vector.shape_cast %64 : vector<8x16x128xbf16> to vector<1x8x16x128xbf16>
    tpu.vector_store %arg7[%c0_20, %c0_21, %c0_22, %c0_23], %67 {strides = array<i32>} : memref<1x8x16x128xbf16, #tpu.memory_space<vmem>>, vector<1x8x16x128xbf16>,
    return
  }
  func.func @transform_0(%arg0: i32, %arg1: i32) -> (i32, i32, i32, i32, i32) {
    %c0_i32 = arith.constant 0 : i32
    %c0_i32_0 = arith.constant 0 : i32
    %c0_i32_1 = arith.constant 0 : i32
    %c0_i32_2 = arith.constant 0 : i32
    return %arg0, %arg1, %c0_i32, %c0_i32_0, %c0_i32_1 : i32, i32, i32, i32, i32
  }
  func.func @transform_1(%arg0: i32, %arg1: i32) -> (i32, i32) {
    %c0_i32 = arith.constant 0 : i32
    %c0_i32_0 = arith.constant 0 : i32
    %c0_i32_1 = arith.constant 0 : i32
    return %c0_i32, %c0_i32_0 : i32, i32
  }
  func.func @transform_2(%arg0: i32, %arg1: i32) -> (i32, i32) {
    %c0_i32 = arith.constant 0 : i32
    %c0_i32_0 = arith.constant 0 : i32
    %c0_i32_1 = arith.constant 0 : i32
    return %c0_i32, %c0_i32_0 : i32, i32
  }
  func.func @transform_3(%arg0: i32, %arg1: i32) -> (i32, i32) {
    %c0_i32 = arith.constant 0 : i32
    %c0_i32_0 = arith.constant 0 : i32
    %c0_i32_1 = arith.constant 0 : i32
    return %c0_i32, %c0_i32_0 : i32, i32
  }
  func.func @transform_4(%arg0: i32, %arg1: i32) -> (i32, i32) {
    %c0_i32 = arith.constant 0 : i32
    %c0_i32_0 = arith.constant 0 : i32
    %c0_i32_1 = arith.constant 0 : i32
    return %c0_i32, %c0_i32_0 : i32, i32
  }
  func.func @transform_5(%arg0: i32, %arg1: i32) -> (i32, i32, i32, i32) {
    %c0_i32 = arith.constant 0 : i32
    %c0_i32_0 = arith.constant 0 : i32
    %c0_i32_1 = arith.constant 0 : i32
    return %arg0, %arg1, %c0_i32, %c0_i32_0 : i32, i32, i32, i32
  }
}

</mosaic_0001>

<bundles_post_ra>
// kernel: tpu_custom_call.1
= control target key start
LH: loop header
LB: loop body
LE: loop exit
PB: predicated region body
PF: predicated region fallthrough
CT: control target
= control target key end

     0   :  { %s4288_s0 = inlined_call_operand.hbm [shape: bf16[2,2,10,16,128], index: 0, kind: input, shape index: {}]   ;;  %s4289_s1 = inlined_call_operand.hbm [shape: bf16[128,128], index: 1, kind: input, shape index: {}]   ;;  %s4290_s2 = inlined_call_operand.vmem [shape: f32[1,128], index: 2, kind: input, shape index: {}]   ;;  %s4291_s3 = inlined_call_operand.hbm [shape: bf16[1152,128], index: 3, kind: input, shape index: {}]   ;;  %s4292_s4 = inlined_call_operand.vmem [shape: f32[1,128], index: 4, kind: input, shape index: {}]   ;;  %s4293_s5 = inlined_call_operand.hbm [shape: bf16[2,16,16,128], index: 5, kind: output, shape index: {}]  }
   0x1   :  { %4303 = sst [smem:[#allocation17_spill]] %s4289_s1 }
   0x2   :  { %4304 = sst [smem:[#allocation18_spill]] %s4291_s3 }
   0x3   :  { %4305 = sst [smem:[#allocation19_spill]] %s4293_s5 }
   0x4   :  { %10 = vsyncpa [#allocation3], 0 }
   0x5   :  { %12 = vsyncpa [#allocation3 + $0x1], 0 }
   0x6   :  { %13 = vsyncpa [#allocation6], 0 }
   0x7   :  { %14 = vsyncpa [#allocation4], 0 }
   0x8   :  { %16 = vsyncpa [#allocation4 + $0x1], 0  ;;  %s3403_s18 = smov 0   ;;  %s3405_s19 = smov 0  }
   0x9   :  { %s3407_s20 = smov 0   ;;  %s3409_s21 = smov 0  }
   0xa   :  { %s3411_s22 = smov 0   ;;  %s3413_s23 = smov 0  }
   0xb   :  { %s3415_s24 = smov 0   ;;  %s3417_s25 = smov 0  }
   0xc LB: > { %4306 = sst [smem:[#allocation12_spill]] %s3334_s18  ;;  %s2392_s26 = sadd.s32 4294967295, %s3362_s25   ;;  %s3362_s25 = sphi %s3417_s25, %s22_s25   ;;  %s3358_s24 = sphi %s3415_s24, %s4348_s24   ;;  %s3354_s23 = sphi %s3413_s23, %s4347_s23   ;;  %s3350_s22 = sphi %s3411_s22, %s4346_s22   ;;  %s3346_s21 = sphi %s3409_s21, %s4345_s21   ;;  %s3342_s20 = sphi %s3407_s20, %s4344_s20   ;;  %s3338_s19 = sphi %s3405_s19, %s4343_s19   ;;  %s3334_s18 = sphi %s3403_s18, %s4342_s18  }
   0xd   : > { %4307 = sst [smem:[#allocation13_spill]] %s3362_s25  ;;  %s2393_s27 = sadd.s32 4294967294, %s3362_s25  }
   0xe   : > { %p56_p0 = scmp.ne.s32.totalorder %s3338_s19, %s3334_s18  ;;  %p3447_p1 = scmp.eq.s32.totalorder %s2392_s26, 0 }
   0xf   : > { %p3451_p2 = scmp.eq.s32.totalorder %s2392_s26, 3  ;;  %p172_p3 = scmp.eq.s32.totalorder %s2393_s27, 3 }
  0x10   : > { %p3457_p4 = por %p3447_p1, %p56_p0  ;;  %p2394_p5 = scmp.ge.s32.totalorder %s3362_s25, 1 }
  0x11   : > { %p3462_p6 = por %p172_p3, %p56_p0  ;;  %p179_p7 = scmp.lt.s32.totalorder %s3362_s25, 5 }
  0x12   : > { %s3364_s8 = smov [#allocation5]   ;;  %s3365_s11 = smov [#allocation7]  }
  0x13   : > { %s4311_s6 = scalar_select %p3462_p6, 1, 0 }
  0x14   : > { %p3467_p8 = pnand %p2394_p5, %p179_p7  ;;  %s191_s9 = sshll.u32 %s3364_s8, 4  ;;  %s192_s9 = int_to_ptr.vmem [resolvable:$true] %s191_s9 }
  0x15   : > { %4312 = sst [smem:[#allocation14_spill]] %s4311_s6  ;;  %s207_s12 = sshll.u32 %s3365_s11, 4  ;;  %s208_s12 = int_to_ptr.vmem [resolvable:$true] %s207_s12 }
  0x16   : > { %p3000_p9 = pneg %p3467_p8  ;;  %s3193_s13 = scalar_lea.vmem %s192_s9, 1024 }
  0x17   : > { %p3194_p12 = scmp.ne.s32.totalorder %s192_s9, %s3193_s13  ;;  %p3201_p3 = scmp.lt.s32.totalorder %s192_s9, %s192_s9 }
  0x18   : > { %p3475_p10 = pnand %p3000_p9, %p3447_p1  ;;  %p3202_p5 = scmp.lt.s32.totalorder %s3193_s13, %s3193_s13 }
  0x1a   : > { %p3184_p11 = pneg %p3475_p10  ;;  %p3203_p7 = por %p3202_p5, %p3201_p3 }
  0x1c   : > { %p3196_p13 = pnand %p3194_p12, %p3184_p11 }
  0x1e   : > { %p3197_p0 = pneg %p3196_p13 }
  0x20   : > { %p3204_p9 = pnand %p3203_p7, %p3197_p0 }
  0x22   : > { %3207 = shalt.err (!%p3204_p9)
}
  0x23   : > { %s4294_s14 = smov 64   ;;  %s4295_s15 = smov 4  }
  0x24   : > { %s4315_s1 = sld [smem:[#allocation17_spill]]  ;;  %s3219_s26 = scalar_lea.vmem %s208_s12, 9216 }
  0x25   : > { %p3220_p12 = scmp.ne.s32.totalorder %s208_s12, %s3219_s26  ;;  %p3227_p0 = scmp.lt.s32.totalorder %s208_s12, %s208_s12 }
  0x26   : > { %p3228_p5 = scmp.lt.s32.totalorder %s3219_s26, %s3219_s26 }
  0x27   : > { %p3222_p13 = pnand %p3220_p12, %p3184_p11 }
  0x28   : > { %p3229_p7 = por %p3228_p5, %p3227_p0 }
  0x29   : > { %p3223_p3 = pneg %p3222_p13 }
  0x2a   : > { %3003 = dma.hbm_to_vmem [thread:$0]  (!%p3475_p10), %s4315_s1, 1024, %s192_s9, [#allocation6], %s4294_s14, %s4294_s14, %s4295_s15  }
  0x2b   : > { %p3230_p9 = pnand %p3229_p7, %p3223_p3 }
  0x2d   : > { %3233 = shalt.err (!%p3230_p9)
}
  0x2e   : > { %s4316_s3 = sld [smem:[#allocation18_spill]]  ;;  %s31_s9 = sadd.s32 1, %s3354_s23 }
  0x2f   : > { %s34_s10 = sadd.s32 1, %s3358_s24  ;;  %p32_p11 = scmp.ge.s32.totalorder %s31_s9, 2 }
  0x30   : > { %s43_s11 = sadd.s32 1, %s3342_s20  ;;  %p50_p12 = scmp.ne.s32.totalorder %s3342_s20, %s3338_s19 }
  0x31   : > { %p51_p13 = scmp.eq.s32.totalorder %s3362_s25, 0  ;;  %s4350_s9 = smov (%p32_p11, %s31_s9), 0 }
  0x32   : > { %4317 = sst [smem:[#allocation15_spill]] %s4350_s9  ;;  %s4352_s10 = smov (!%p32_p11, %s34_s10), %s3358_s24 }
  0x33   : > { %s39_s13 = ssub.s32 %s3354_s23, %s4350_s9  ;;  %p3514_p3 = por %p51_p13, %p50_p12 }
  0x34   : > { %3006 = dma.hbm_to_vmem [thread:$0]  (!%p3475_p10), %s4316_s3, 9216, %s208_s12, [#allocation6], %s4294_s14, %s4294_s14, %s4295_s15  }
  0x35   : > { %p36_p10 = scmp.ge.s32.totalorder %s4352_s10, 2  ;;  %p3520_p0 = por %p3451_p2, %p50_p12 }
  0x36   : > { %p3017_p5 = scmp.lt.s32.totalorder %s3362_s25, 4  ;;  %s224_s17 = sand.u32 1, %s3342_s20  }
  0x37   : > { %s4354_s10 = smov (%p36_p10, %s4352_s10), 0  ;;  %s2984_s26 = smul.u32 80, %s224_s17 }
  0x38   : > { %4320 = sst [smem:[#allocation16_spill]] %s4354_s10  ;;  %s38_s27 = ssub.s32 %s3358_s24, %s4354_s10 }
  0x39   : > { %s2985_s8 = smul.u32 20, %s3354_s23  ;;  %s40_s14 = sor.u32 %s39_s13, %s38_s27 }
  0x3a   : > { %p41_p7 = scmp.eq.s32.totalorder %s40_s14, 0  ;;  %s2986_s15 = smul.u32 40, %s3358_s24 }
  0x3b   : > { %s228_s1 = scalar_lea.vmem [#allocation2], %s2984_s26  ;;  %p3534_p9 = pnand %p3017_p5, %p3514_p3 }
  0x3c   : > { %s237_s3 = sshll.u32 %s228_s1, 4  ;;  %s234_s6 = sadd.s32 %s2986_s15, %s2985_s8  ;;  %s238_s3 = int_to_ptr.vmem [resolvable:$true] %s237_s3 }
  0x3d   : > { %s3539_s9 = scalar_select %p41_p7, %s3342_s20, %s43_s11  }
  0x3e   : > { %s2398_s18 = sshll.u32 %s234_s6, 6  ;;  %s225_s13 = scalar_lea.sflag [#allocation3], %s224_s17 }
  0x3f   : > { %s236_s10 = scalar_lea.hbm %s4288_s0, %s2398_s18  ;;  %p3236_p2 = pneg %p3534_p9 }
  0x40   : > { %s3247_s14 = scalar_lea.vmem %s238_s3, 1280  ;;  %s3368_s1 = smov [#allocation2]  }
  0x41   : > { %p3248_p11 = scmp.ne.s32.totalorder %s238_s3, %s3247_s14  ;;  %s3252_s16 = sshll.u32 %s3368_s1, 4  ;;  %s3253_s16 = int_to_ptr.vmem [resolvable:$false] %s3252_s16 }
  0x42   : > { %s3254_s26 = scalar_lea.vmem %s3253_s16, 2560  ;;  %p3255_p3 = scmp.lt.s32.totalorder %s238_s3, %s3253_s16 }
  0x43   : > { %p3250_p12 = pnand %p3248_p11, %p3236_p2  ;;  %p3256_p10 = scmp.lt.s32.totalorder %s3254_s26, %s3247_s14 }
  0x45   : > { %p3251_p13 = pneg %p3250_p12  ;;  %p3257_p5 = por %p3256_p10, %p3255_p3 }
  0x47   : > { %p3258_p7 = pnand %p3257_p5, %p3251_p13 }
  0x49   : > { %3261 = shalt.err (!%p3258_p7)
}
  0x4a   : > { %s4322_s5 = smov 4   ;;  %s4323_s18 = smov 64  }
  0x4b   : > { %3010 = dma.hbm_to_vmem [thread:$0]  (!%p3534_p9), %s236_s10, 1280, %s238_s3, %s225_s13, %s4323_s18, %s4323_s18, %s4322_s5  }
  0x4c   : > { %249 = sbr.rel (%p3467_p8) target bundleno = 722 (0x2d2), region = 40  ;;  %s3554_s25 = sand.u32 (!%p3467_p8), 1, %s3338_s19  }
  0x4d   : > { %s2987_s6 = smul.u32 (!%p3467_p8), 80, %s3554_s25  ;;  %s252_s15 = scalar_lea.sflag (!%p3467_p8), [#allocation3], %s3554_s25 }
  0x4f   : > { %s3558_s11 = scalar_lea.vmem (!%p3467_p8), [#allocation2], %s2987_s6 }
  0x51   : > { %3321 = dma.done.wait (%p3457_p4), %s252_s15, 1280  }
  0x52   : > { %3323 = vsyncadd (%p3457_p4), %s252_s15, 4294966016 }
  0x53   : > { %3325 = dma.done.wait (%p3447_p1), [#allocation6], 10240  }
  0x54   : > { %3327 = vsyncadd (%p3447_p1), [#allocation6], 4294957056  ;;  %v3092_v0 = vld [vmem:[#allocation5 + $0x38] sm:$0xff]   ;;  %v3093_v1 = vld [vmem:[#allocation5 + $0x30] sm:$0xff]   ;;  %s2422_s3 = sshll.u32 %s3346_s21, 3  ;;  %v3369_v46 = vmov 0.0  }
  0x55   : > { %2852 = vmatprep.subr.bf16.mxu0 %v3092_v0  ;;  %v3094_v2 = vld [vmem:[#allocation5 + $0x28] sm:$0xff]   ;;  %v3095_v3 = vld [vmem:[#allocation5 + $0x20] sm:$0xff]   ;;  %v3096_v5 = vld [vmem:[#allocation5 + $0x18] sm:$0xff]   ;;  %s2423_s28 = sadd.s32 4294967295, %s2422_s3  ;;  %s2402_s27 = sshll.u32 %s3554_s25, 6 }
  0x56   : > { %2853 = vmatpush3.bf16.msra.mxu0 %v3092_v0  ;;  %v3100_v4 = vld [vmem:[%s3558_s11] sm:$0xff]   ;;  %v3098_v7 = vld [vmem:[#allocation5 + $0x8] sm:$0xff]   ;;  %v3110_v8 = vld [vmem:[#allocation7 + $0x138] sm:$0xff]   ;;  %v3582_v43 = vstv %s2423_s28  ;;  %s4181_s8 = scalar_lea.vmem [#allocation8], %s2402_s27  ;;  %s2546_s29 = sshll.u32 %s3346_s21, 4 }
  0x57   : > { %2854 = vmatprep.subr.bf16.mxu0 %v3093_v1  ;;  %2868 = vmatprep.mubr.bf16.mxu0 %v3100_v4  ;;  %v3097_v6 = vld [vmem:[#allocation5 + $0x10] sm:$0xff]   ;;  %v3111_v9 = vld [vmem:[#allocation7 + $0xf8] sm:$0xff]   ;;  %v3099_v10 = vld [vmem:[#allocation5] sm:$0xff]   ;;  %v587_v45 = vadd.s32 9, %v3582_v43  ;;  %v579_v48 = vadd.s32 1, %v3582_v43  ;;  %vm588_vm5 = vcmp.ge.s32.totalorder %v3582_v43, 0 }
  0x58   : > { %2612 = vmatprep.subr.bf16.mxu1 %v3110_v8  ;;  %v3101_v11 = vld [vmem:[%s3558_s11 + $0x8] sm:$0xff]   ;;  %v3102_v12 = vld [vmem:[%s3558_s11 + $0x10] sm:$0xff]   ;;  %v3103_v13 = vld [vmem:[%s3558_s11 + $0x18] sm:$0xff]   ;;  %vm598_vm6 = vcmp.lt.s32.totalorder %v3582_v43, 16  ;;  %v581_v52 = vadd.s32 3, %v3582_v43  ;;  %v580_v54 = vadd.s32 2, %v3582_v43 }
  0x59   : > { %2613 = vmatpush3.bf16.msra.mxu1 %v3111_v9  ;;  %v3104_v14 = vld [vmem:[%s3558_s11 + $0x20] sm:$0xff]   ;;  %v3105_v15 = vld [vmem:[%s3558_s11 + $0x28] sm:$0xff]   ;;  %v3106_v16 = vld [vmem:[%s3558_s11 + $0x30] sm:$0xff]   ;;  %vm597_vm0 = vcmp.ge.s32.totalorder %v587_v45, 0  ;;  %vm607_vm1 = vcmp.lt.s32.totalorder %v587_v45, 16  ;;  %vm589_vm3 = vcmp.ge.s32.totalorder %v579_v48, 0 }
  0x5a   : > { %2855 = vmatpush3.bf16.msra.mxu0 %v3093_v1  ;;  %v3107_v17 = vld [vmem:[%s3558_s11 + $0x38] sm:$0xff]   ;;  %v3108_v18 = vld [vmem:[%s3558_s11 + $0x40] sm:$0xff]   ;;  %v3109_v19 = vld [vmem:[%s3558_s11 + $0x48] sm:$0xff]   ;;  %vm599_vm4 = vcmp.lt.s32.totalorder %v579_v48, 16  ;;  %v583_v55 = vadd.s32 5, %v3582_v43  ;;  %v582_v60 = vadd.s32 4, %v3582_v43 }
  0x5b   : > { %2856 = vmatprep.subr.bf16.mxu0 %v3094_v2  ;;  %v3112_v20 = vld [vmem:[#allocation7 + $0x130] sm:$0xff]   ;;  %v3114_v22 = vld [vmem:[#allocation7 + $0x178] sm:$0xff]   ;;  %v3115_v23 = vld [vmem:[#allocation7 + $0x128] sm:$0xff]   ;;  %v584_v61 = vadd.s32 6, %v3582_v43  ;;  %vm591_vm9 = vcmp.ge.s32.totalorder %v581_v52, 0  ;;  %vm601_vm10 = vcmp.lt.s32.totalorder %v581_v52, 16 }
  0x5c   : > { %v3113_v21 = vld [vmem:[#allocation7 + $0xf0] sm:$0xff]   ;;  %2614 = vmatprep.subr.bf16.mxu1 %v3112_v20  ;;  %v3116_v24 = vld [vmem:[#allocation7 + $0xe8] sm:$0xff]   ;;  %v3118_v26 = vld [vmem:[#allocation7 + $0x120] sm:$0xff]   ;;  %vm590_vm11 = vcmp.ge.s32.totalorder %v580_v54, 0  ;;  %vm600_vm12 = vcmp.lt.s32.totalorder %v580_v54, 16  ;;  %vm593_vm13 = vcmp.ge.s32.totalorder %v583_v55, 0 }
  0x5d   : > { %2615 = vmatpush3.bf16.msra.mxu1 %v3113_v21  ;;  %v3117_v25 = vld [vmem:[#allocation7 + $0x170] sm:$0xff]   ;;  %v3119_v27 = vld [vmem:[#allocation7 + $0xe0] sm:$0xff]   ;;  %v3120_v28 = vld [vmem:[#allocation7 + $0x168] sm:$0xff]   ;;  %v585_v1 = vadd.s32 7, %v3582_v43  ;;  %vm603_vm14 = vcmp.lt.s32.totalorder %v583_v55, 16  ;;  %s2526_s13 = sshll.u32 %s3350_s22, 5 }
  0x5e   : > { %2857 = vmatpush3.bf16.msra.mxu0 %v3094_v2  ;;  %2616 = vmatprep.subr.bf16.mxu1 %v3115_v23  ;;  %v3121_v29 = vld [vmem:[#allocation7 + $0x118] sm:$0xff]   ;;  %v3123_v31 = vld [vmem:[#allocation7 + $0x160] sm:$0xff]   ;;  %v3124_v32 = vld [vmem:[#allocation7 + $0x110] sm:$0xff]   ;;  %s2280_s14 = sadd.s32 %s2546_s29, %s2526_s13  ;;  %s2283_s21 = sshll.u32 %s4181_s8, 4  ;;  %s4228_s21 = int_to_ptr.vmem [resolvable:$true] %s2283_s21 }
  0x5f   : > { %2858 = vmatprep.subr.bf16.mxu0 %v3095_v3  ;;  %v3122_v30 = vld [vmem:[#allocation7 + $0xd8] sm:$0xff]   ;;  %v3125_v33 = vld [vmem:[#allocation7 + $0xd0] sm:$0xff]   ;;  %v3127_v35 = vld [vmem:[#allocation7 + $0x108] sm:$0xff]   ;;  %s2527_s22 = sshll.u32 %s2280_s14, 6  ;;  %s4336_s26 = sld [smem:[#allocation19_spill]] }
  0x60   : > { %v3126_v34 = vld [vmem:[#allocation7 + $0x158] sm:$0xff]   ;;  %v3128_v36 = vld [vmem:[#allocation7 + $0xc8] sm:$0xff]   ;;  %v3129_v37 = vld [vmem:[#allocation7 + $0x150] sm:$0xff]   ;;  %s2267_s18 = scalar_lea.sflag [#allocation4], %s3554_s25  ;;  %s3262_s6 = scalar_lea.vmem %s4228_s21, 1024 }
  0x61   : > { %2617 = vmatpush3.bf16.msra.mxu1 %v3116_v24  ;;  %v3130_v38 = vld [vmem:[#allocation7 + $0x100] sm:$0xff]   ;;  %v3132_v40 = vld [vmem:[#allocation7 + $0x148] sm:$0xff]   ;;  %v3578_v42 = vld [vmem:[#allocation7 + $0xb8] sm:$0xff]   ;;  %p3263_p1 = scmp.ne.s32.totalorder %s4228_s21, %s3262_s6  ;;  %s3370_s15 = smov [#allocation8]  }
  0x62   : > { %2859 = vmatpush3.bf16.msra.mxu0 %v3095_v3  ;;  %2618 = vmatprep.subr.bf16.mxu1 %v3118_v26  ;;  %v3131_v39 = vld [vmem:[#allocation7 + $0xc0] sm:$0xff]   ;;  %v3134_v44 = vld [vmem:[#allocation7 + $0x78] sm:$0xff]   ;;  %vm617_vm2 = vmand %vm597_vm0, %vm607_vm1  ;;  %vm592_vm0 = vcmp.ge.s32.totalorder %v582_v60, 0  ;;  %vm602_vm1 = vcmp.lt.s32.totalorder %v582_v60, 16  ;;  %s3266_s11 = sshll.u32 %s3370_s15, 4  ;;  %s3267_s11 = int_to_ptr.vmem [resolvable:$false] %s3266_s11 }
  0x63   : > { %2860 = vmatprep.subr.bf16.mxu0 %v3096_v5  ;;  %v3133_v41 = vld [vmem:[#allocation7 + $0x140] sm:$0xff]   ;;  %v3586_v47 = vsel %vm617_vm2, 1.0, %v3369_v46  ;;  %vm609_vm7 = vmand %vm589_vm3, %vm599_vm4  ;;  %vm594_vm2 = vcmp.ge.s32.totalorder %v584_v61, 0  ;;  %vm604_vm3 = vcmp.lt.s32.totalorder %v584_v61, 16  ;;  %p3264_p4 = pnand %p3263_p1, %p3520_p0  ;;  %s3268_s3 = scalar_lea.vmem %s3267_s11, 2048 }
  0x64   : > { %v3592_v49 = vld [vmem:[%s4290_s2] ss:$0 sm:$0xff]  ;;  %vm608_vm8 = vmand %vm588_vm5, %vm598_vm6  ;;  %v2425_v57 = vsel %vm609_vm7, 1.0, %v3369_v46  ;;  %vm595_vm6 = vcmp.ge.s32.totalorder %v585_v1, 0  ;;  %vm605_vm7 = vcmp.lt.s32.totalorder %v585_v1, 16  ;;  %p3269_p9 = scmp.lt.s32.totalorder %s4228_s21, %s3267_s11  ;;  %p3270_p2 = scmp.lt.s32.totalorder %s3268_s3, %s3262_s6 }
  0x65   : > { %2619 = vmatpush3.bf16.msra.mxu1 %v3119_v27  ;;  %v2424_v58 = vsel %vm608_vm8, 1.0, %v3369_v46  ;;  %vm3608_vm15 = vmand %vm591_vm9, %vm601_vm10  ;;  %vm758_vm9 = vcmask 1040384   ;;  %vm759_vm10 = vsmask.f32 256  ;;  %s4234_s5 = scalar_lea.hbm %s4336_s26, %s2527_s22  ;;  %p3265_p8 = pneg %p3264_p4 }
  0x66   : > { %2861 = vmatpush3.bf16.msra.mxu0 %v3096_v5  ;;  %2620 = vmatprep.subr.bf16.mxu1 %v3121_v29  ;;  %vm610_vm4 = vmand %vm590_vm11, %vm600_vm12  ;;  %vm902_vm12 = vcmask 1046528   ;;  %p3271_p11 = por %p3270_p2, %p3269_p9 }
  0x67   : > { %2862 = vmatprep.subr.bf16.mxu0 %v3097_v6  ;;  %vm3616_vm5 = vmand %vm593_vm13, %vm603_vm14 }
  0x68   : > { %vm3623_vm8 = vmand %vm592_vm0, %vm602_vm1  ;;  %p3272_p12 = pnand %p3271_p11, %p3265_p8 }
  0x69   : > { %2621 = vmatpush3.bf16.msra.mxu1 %v3122_v30  ;;  %vm3633_vm11 = vmand %vm594_vm2, %vm604_vm3  ;;  %v3648_v29 = vsel %vm3623_vm8, 1.0, %v3369_v46 }
  0x6a   : > { %2863 = vmatpush3.bf16.msra.mxu0 %v3097_v6  ;;  %2622 = vmatprep.subr.bf16.mxu1 %v3124_v32  ;;  %vm615_vm13 = vmand %vm595_vm6, %vm605_vm7 }
  0x6b   : > { %2864 = vmatprep.subr.bf16.mxu0 %v3098_v7  ;;  %vm3652_vm14 = vmand %vm758_vm9, %vm759_vm10 }
  0x6d   : > { %2623 = vmatpush3.bf16.msra.mxu1 %v3125_v33 }
  0x6e   : > { %2865 = vmatpush3.bf16.msra.mxu0 %v3098_v7  ;;  %2624 = vmatprep.subr.bf16.mxu1 %v3127_v35 }
  0x6f   : > { %2866 = vmatprep.subr.bf16.mxu0 %v3099_v10 }
  0x71   : > { %2625 = vmatpush3.bf16.msra.mxu1 %v3128_v36 }
  0x72   : > { %2867 = vmatpush3.bf16.msra.mxu0 %v3099_v10  ;;  %2626 = vmatprep.subr.bf16.mxu1 %v3130_v38  ;;  %v3664_v38 = vsel %vm3633_vm11, 1.0, %v3369_v46 }
  0x73   : > { %2888 = vmatprep.subr.bf16.mxu0 %v3114_v22 }
  0x75   : > { %2869 = vmatmul.mubr.bf16.vlgmr.msra.gmra.mxu0 %v3101_v11  ;;  %2627 = vmatpush3.bf16.msra.mxu1 %v3131_v39  ;;  %v3667_v39 = vadd.s32 8, %v3582_v43 }
  0x76   : > { %2872 = vmatprep.mubr.bf16.mxu0 %v3102_v12  ;;  %2889 = vmatpush3.bf16.msra.mxu0 %v3114_v22 }
  0x77   : > { %2890 = vmatprep.subr.bf16.mxu0 %v3117_v25  ;;  %2692 = vmatprep.subr.bf16.mxu1 %v3134_v44  ;;  %vm596_vm0 = vcmp.ge.s32.totalorder %v3667_v39, 0  ;;  %vm606_vm1 = vcmp.lt.s32.totalorder %v3667_v39, 16 }
  0x78   : > { %vm3728_vm2 = vmand %vm596_vm0, %vm606_vm1 }
  0x7a   : > { %2891 = vmatpush3.bf16.msra.mxu0 %v3117_v25 }
  0x7b   : > { %2892 = vmatprep.subr.bf16.mxu0 %v3120_v28 }
  0x7d   : > { %2873 = vmatmul.mubr.bf16.gmra.mxu0 %v3103_v13 }
  0x7e   : > { %2876 = vmatprep.mubr.bf16.mxu0 %v3104_v14  ;;  %2893 = vmatpush3.bf16.msra.mxu0 %v3120_v28  ;;  %v2429_v28 = vsel %vm3616_vm5, 1.0, %v3369_v46 }
  0x7f   : > { %2894 = vmatprep.subr.bf16.mxu0 %v3123_v31 }
  0x82   : > { %2895 = vmatpush3.bf16.msra.mxu0 %v3123_v31 }
  0x83   : > { %2896 = vmatprep.subr.bf16.mxu0 %v3126_v34 }
  0x85   : > { %2877 = vmatmul.mubr.bf16.gmra.mxu0 %v3105_v15 }
  0x86   : > { %2880 = vmatprep.mubr.bf16.mxu0 %v3106_v16  ;;  %2897 = vmatpush3.bf16.msra.mxu0 %v3126_v34 }
  0x87   : > { %2898 = vmatprep.subr.bf16.mxu0 %v3129_v37 }
  0x8a   : > { %2899 = vmatpush3.bf16.msra.mxu0 %v3129_v37  ;;  %v3659_v37 = vsel %vm615_vm13, 1.0, %v3369_v46 }
  0x8b   : > { %2900 = vmatprep.subr.bf16.mxu0 %v3132_v40 }
  0x8d   : > { %2881 = vmatmul.mubr.bf16.gmra.mxu0 %v3107_v17 }
  0x8e   : > { %2884 = vmatprep.mubr.bf16.mxu0 %v3108_v18  ;;  %2901 = vmatpush3.bf16.msra.mxu0 %v3132_v40  ;;  %v2427_v18 = vsel %vm3608_vm15, 1.0, %v3369_v46  ;;  %vm781_vm15 = vsmask.f32 7424 }
  0x8f   : > { %2902 = vmatprep.subr.bf16.mxu0 %v3133_v41 }
  0x92   : > { %2903 = vmatpush3.bf16.msra.mxu0 %v3133_v41 }
  0x93   : > { %2920 = vmatprep.subr.bf16.mxu0 %v3578_v42 }
  0x95   : > { %2885 = vmatmul.mubr.bf16.gmra.mxu0 %v3109_v19  ;;  %v2426_v19 = vsel %vm610_vm4, 1.0, %v3369_v46 }
 0x135   : > { %v2870_v50 = vpop.f32.mrf.mxu0 }
 0x136   : > { %v486_v51 = vadd.f32 %v2870_v50, %v3592_v49 }
 0x137   : > { %v477_v53 = vpop.f32.mrf.mxu0 }
 0x138   : > { %v478_v56 = vadd.f32 %v3592_v49, %v477_v53  ;;  %v558_v62 = vmax.f32 %v486_v51, 0.0 }
 0x139   : > { %v2871_v59 = vpop.f32.mrf.mxu0 }
 0x13a   : > { %v489_v63 = vadd.f32 %v2871_v59, %v3592_v49  ;;  %v556_v2 = vmax.f32 %v478_v56, 0.0  ;;  %v640_v7 = vmul.f32 %v2425_v57, %v558_v62 }
 0x13b   : > { %v480_v0 = vpop.f32.mrf.mxu0 }
 0x13c   : > { %v559_v3 = vmax.f32 %v489_v63, 0.0  ;;  %v481_v4 = vadd.f32 %v3592_v49, %v480_v0  ;;  %v638_v13 = vmul.f32 %v2424_v58, %v556_v2 }
 0x13d   : > { %v2874_v5 = vpop.f32.mrf.mxu0 }
 0x13e   : > { %v641_v8 = vmul.f32 %v2425_v57, %v559_v3  ;;  %v557_v9 = vmax.f32 %v481_v4, 0.0  ;;  %v502_v10 = vadd.f32 %v2874_v5, %v3592_v49 }
 0x13f   : > { %v493_v11 = vpop.f32.mrf.mxu0 }
 0x140   : > { %v659_v14 = vpack.c.bf16 %v641_v8, %v640_v7  ;;  %v639_v15 = vmul.f32 %v2424_v58, %v557_v9  ;;  %v494_v16 = vadd.f32 %v3592_v49, %v493_v11  ;;  %v562_v24 = vmax.f32 %v502_v10, 0.0 }
 0x141   : > { %v2875_v20 = vpop.f32.mrf.mxu0 }
 0x142   : > { %v676_v22 = vshrl.u32 %v659_v14, 16  ;;  %v3637_v23 = vpack.c.bf16 %v639_v15, %v638_v13  ;;  %v560_v25 = vmax.f32 %v494_v16, 0.0  ;;  %v505_v26 = vadd.f32 %v2875_v20, %v3592_v49 }
 0x143   : > { %v496_v27 = vpop.f32.mrf.mxu0  ;;  %v679_v31 = vshll.u32 %v659_v14, 16  ;;  %v644_v41 = vmul.f32 %v2427_v18, %v562_v24 }
 0x144   : > { %v678_v30 = vrot.slane %v676_v22, 7  ;;  %v669_v33 = vshrl.u32 %v3637_v23, 16  ;;  %v497_v34 = vadd.f32 %v3592_v49, %v496_v27  ;;  %v563_v35 = vmax.f32 %v505_v26, 0.0 }
 0x145   : > { %v2878_v36 = vpop.f32.mrf.mxu0  ;;  %v672_v48 = vshll.u32 %v3637_v23, 16  ;;  %v642_v50 = vmul.f32 %v2426_v19, %v560_v25 }
 0x146   : > { %v681_v40 = vor.u32 %v679_v31, %v678_v30  ;;  %v561_v44 = vmax.f32 %v497_v34, 0.0  ;;  %v518_v45 = vadd.f32 %v2878_v36, %v3592_v49  ;;  %v645_v51 = vmul.f32 %v2427_v18, %v563_v35 }
 0x147   : > { %v509_v52 = vpop.f32.mrf.mxu0  ;;  %v772_v53 = vsel %vm3652_vm14, %v678_v30, 0  ;;  %v3677_v55 = vrot.slane %v669_v33, 7 }
 0x148   : > { %v3675_v54 = vsel %vm3652_vm14, 0, %v681_v40  ;;  %v643_v43 = vmul.f32 %v2426_v19, %v561_v44  ;;  %v566_v56 = vmax.f32 %v518_v45, 0.0  ;;  %v661_v57 = vpack.c.bf16 %v645_v51, %v644_v41 }
 0x149   : > { %v510_v58 = vadd.f32 %v3592_v49, %v509_v52  ;;  %v2879_v59 = vpop.f32.mrf.mxu0  ;;  %v906_v60 = vrot.slane %v3675_v54, 1  ;;  %v907_v61 = vrot.slane %v772_v53, 1  ;;  %v795_v1 = vshrl.u32 %v3675_v54, 16 }
 0x14a   : > { %v660_v62 = vpack.c.bf16 %v643_v43, %v642_v50  ;;  %v648_v63 = vmul.f32 %v2429_v28, %v566_v56  ;;  %v521_v0 = vadd.f32 %v2879_v59, %v3592_v49  ;;  %v690_v2 = vshrl.u32 %v661_v57, 16  ;;  %v3135_v50 = vld [vmem:[#allocation7 + $0x38] sm:$0xff]   ;;  %v3137_v56 = vld [vmem:[#allocation7 + $0x70] sm:$0xff]  }
 0x14b   : > { %v693_v3 = vshll.u32 %v661_v57, 16  ;;  %v564_v4 = vmax.f32 %v510_v58, 0.0  ;;  %v512_v5 = vpop.f32.mrf.mxu0  ;;  %v3686_v6 = vsel %vm902_vm12, %v906_v60, %v907_v61  ;;  %v797_v14 = vshll.u32 %v3675_v54, 16 }
 0x14c   : > { %v683_v7 = vshrl.u32 %v660_v62, 16  ;;  %v686_v8 = vshll.u32 %v660_v62, 16  ;;  %v567_v9 = vmax.f32 %v521_v0, 0.0  ;;  %v513_v10 = vadd.f32 %v3592_v49, %v512_v5  ;;  %2904 = vmatprep.mubr.bf16.mxu0 %v3686_v6 }
 0x14d   : > { %v692_v11 = vrot.slane %v690_v2, 7  ;;  %v646_v12 = vmul.f32 %v3648_v29, %v564_v4  ;;  %v2882_v13 = vpop.f32.mrf.mxu0  ;;  %v802_v15 = vshll.u32 %v772_v53, 16  ;;  %v799_v22 = vrot.slane %v797_v14, 1 }
 0x14e   : > { %v685_v16 = vrot.slane %v683_v7, 7  ;;  %v649_v17 = vmul.f32 %v2429_v28, %v567_v9  ;;  %v565_v18 = vmax.f32 %v513_v10, 0.0  ;;  %v534_v19 = vadd.f32 %v2882_v13, %v3592_v49  ;;  %v3139_v13 = vld [vmem:[#allocation7 + $0x30] sm:$0xff]  }
 0x14f   : > { %v695_v20 = vor.u32 %v693_v3, %v692_v11  ;;  %v525_v21 = vpop.f32.mrf.mxu0  ;;  %v804_v24 = vrot.slane %v802_v15, 1  ;;  %v3695_v25 = vsel %vm3652_vm14, %v692_v11, 0  ;;  %v800_v35 = vor.u32 %v799_v22, %v795_v1 }
 0x150   : > { %v688_v26 = vor.u32 %v686_v8, %v685_v16  ;;  %v3699_v27 = vsel %vm3652_vm14, %v685_v16, 0  ;;  %v663_v30 = vpack.c.bf16 %v649_v17, %v648_v63  ;;  %v647_v31 = vmul.f32 %v3648_v29, %v565_v18  ;;  %v3138_v8 = vld [vmem:[#allocation7 + $0xb0] sm:$0xff]   ;;  %v3141_v17 = vld [vmem:[#allocation7 + $0x68] sm:$0xff]  }
 0x151   : > { %v3704_v28 = vsel %vm3652_vm14, 0, %v695_v20  ;;  %v570_v33 = vmax.f32 %v534_v19, 0.0  ;;  %v526_v34 = vadd.f32 %v3592_v49, %v525_v21  ;;  %v2883_v36 = vpop.f32.mrf.mxu0  ;;  %v3713_v52 = vsel %vm781_vm15, %v800_v35, %v804_v24  ;;  %v3140_v24 = vld [vmem:[#allocation7 + $0xa8] sm:$0xff]  }
 0x152   : > { %v3709_v40 = vsel %vm3652_vm14, 0, %v688_v26  ;;  %v704_v41 = vshrl.u32 %v663_v30, 16  ;;  %v707_v44 = vshll.u32 %v663_v30, 16  ;;  %v662_v45 = vpack.c.bf16 %v647_v31, %v646_v12  ;;  %1226 = vmatprep.mubr.bf16.mxu1 %v3713_v52 }
 0x153   : > { %v652_v51 = vmul.f32 %v3659_v37, %v570_v33  ;;  %v568_v29 = vmax.f32 %v526_v34, 0.0  ;;  %v537_v53 = vadd.f32 %v2883_v36, %v3592_v49  ;;  %v528_v43 = vpop.f32.mrf.mxu0  ;;  %1227 = vmatmul.mubr.bf16.vlgmr.msra.gmra.mxu1 %v3675_v54  ;;  %v909_v0 = vrot.slane %v3709_v40, 1  ;;  %v3143_v34 = vld [vmem:[#allocation7 + $0x28] sm:$0xff]  }
 0x154   : > { %v3716_v57 = vrot.slane %v704_v41, 7  ;;  %v697_v58 = vshrl.u32 %v662_v45, 16  ;;  %v700_v59 = vshll.u32 %v662_v45, 16  ;;  %v529_v60 = vadd.f32 %v3592_v49, %v528_v43  ;;  %2693 = vmatpush3.bf16.msra.mxu1 %v3135_v50  ;;  %v3145_v45 = vld [vmem:[#allocation7 + $0x60] sm:$0xff]  }
 0x155   : > { %v650_v61 = vmul.f32 %v3664_v38, %v568_v29  ;;  %v571_v62 = vmax.f32 %v537_v53, 0.0  ;;  %v2886_v63 = vpop.f32.mrf.mxu0  ;;  %v910_v1 = vrot.slane %v3699_v27, 1  ;;  %v912_v39 = vrot.slane %v3704_v28, 1  ;;  %2694 = vmatprep.subr.bf16.mxu1 %v3137_v56 }
 0x156   : > { %v709_v3 = vor.u32 %v707_v44, %v3716_v57  ;;  %v3733_v4 = vrot.slane %v697_v58, 7  ;;  %v569_v5 = vmax.f32 %v529_v60, 0.0  ;;  %v550_v7 = vadd.f32 %v2886_v63, %v3592_v49  ;;  %v3142_v60 = vld [vmem:[#allocation7 + $0xa0] sm:$0xff]  }
 0x157   : > { %v653_v9 = vmul.f32 %v3659_v37, %v571_v62  ;;  %v3738_v10 = vsel %vm902_vm12, %v909_v0, %v910_v1  ;;  %v541_v11 = vpop.f32.mrf.mxu0  ;;  %v913_v12 = vrot.slane %v3695_v25, 1  ;;  %v3745_v14 = vor.u32 %v672_v48, %v3677_v55 }
 0x158   : > { %v651_v15 = vmul.f32 %v3664_v38, %v569_v5  ;;  %v574_v16 = vmax.f32 %v550_v7, 0.0  ;;  %2905 = vmatmul.mubr.bf16.vlgmr.msra.gmra.mxu0 %v3738_v10  ;;  %v2432_v37 = vsel %vm3728_vm2, 1.0, %v3369_v46  ;;  %v702_v18 = vor.u32 %v700_v59, %v3733_v4  ;;  %2695 = vmatpush3.bf16.msra.mxu1 %v3139_v13 }
 0x159   : > { %v665_v19 = vpack.c.bf16 %v653_v9, %v652_v51  ;;  %v542_v20 = vadd.f32 %v3592_v49, %v541_v11  ;;  %v3755_v21 = vsel %vm902_vm12, %v912_v39, %v913_v12  ;;  %2921 = vmatpush3.bf16.msra.mxu0 %v3578_v42  ;;  %v2887_v23 = vpop.f32.mrf.mxu0  ;;  %v3760_v38 = vsel %vm3652_vm14, 0, %v709_v3  ;;  %2696 = vmatprep.subr.bf16.mxu1 %v3141_v17  ;;  %v3147_v3 = vld [vmem:[#allocation7 + $0x20] sm:$0xff]   ;;  %v3149_v9 = vld [vmem:[#allocation7 + $0x58] sm:$0xff]  }
 0x15a   : > { %v664_v48 = vpack.c.bf16 %v651_v15, %v650_v61  ;;  %v656_v22 = vmul.f32 %v3586_v47, %v574_v16  ;;  %2908 = vmatprep.mubr.bf16.mxu0 %v3755_v21  ;;  %v553_v46 = vadd.f32 %v2887_v23, %v3592_v49  ;;  %2922 = vmatprep.subr.bf16.mxu0 %v3138_v8  ;;  %v807_v31 = vshrl.u32 %v3709_v40, 16  ;;  %v3151_v23 = vld [vmem:[#allocation7 + $0x18] sm:$0xff]  }
 0x15b   : > { %v718_v26 = vshrl.u32 %v665_v19, 16  ;;  %v572_v30 = vmax.f32 %v542_v20, 0.0  ;;  %v809_v42 = vshll.u32 %v3709_v40, 16  ;;  %v544_v33 = vpop.f32.mrf.mxu0  ;;  %v814_v44 = vshll.u32 %v3699_v27, 16 }
 0x15c   : > { %v711_v35 = vshrl.u32 %v664_v48, 16  ;;  %v714_v36 = vshll.u32 %v664_v48, 16  ;;  %v575_v41 = vmax.f32 %v553_v46, 0.0  ;;  %v3770_v50 = vsel %vm3652_vm14, 0, %v702_v18  ;;  %2697 = vmatpush3.bf16.msra.mxu1 %v3143_v34 }
 0x15d   : > { %v721_v51 = vshll.u32 %v665_v19, 16  ;;  %v811_v29 = vrot.slane %v809_v42, 1  ;;  %v545_v53 = vadd.f32 %v3592_v49, %v544_v33  ;;  %2923 = vmatpush3.bf16.msra.mxu0 %v3138_v8  ;;  %v3773_v43 = vrot.slane %v718_v26, 7  ;;  %2698 = vmatprep.subr.bf16.mxu1 %v3145_v45  ;;  %v3146_v42 = vld [vmem:[#allocation7 + $0x90] sm:$0xff]  }
 0x15e   : > { %v713_v56 = vrot.slane %v711_v35, 7  ;;  %v654_v58 = vmul.f32 %v2432_v37, %v572_v30  ;;  %v657_v59 = vmul.f32 %v3586_v47, %v575_v41  ;;  %2924 = vmatprep.subr.bf16.mxu0 %v3140_v24  ;;  %v816_v61 = vrot.slane %v814_v44, 1  ;;  %v3154_v33 = vld [vmem:[#allocation7 + $0x50] sm:$0xff]  }
 0x15f   : > { %v812_v27 = vor.u32 %v811_v29, %v807_v31  ;;  %v573_v62 = vmax.f32 %v545_v53, 0.0  ;;  %v821_v63 = vshll.u32 %v3704_v28, 16  ;;  %v826_v2 = vshll.u32 %v3695_v25, 16  ;;  %v3156_v53 = vld [vmem:[#allocation7 + $0x10] sm:$0xff]  }
 0x160   : > { %v716_v0 = vor.u32 %v714_v36, %v713_v56  ;;  %v667_v1 = vpack.c.bf16 %v657_v59, %v656_v22  ;;  %v775_v49 = vsel %vm3652_vm14, %v3733_v4, 0  ;;  %v819_v7 = vshrl.u32 %v3704_v28, 16  ;;  %2699 = vmatpush3.bf16.msra.mxu1 %v3147_v3 }
 0x161   : > { %v3782_v47 = vsel %vm781_vm15, %v812_v27, %v816_v61  ;;  %v655_v5 = vmul.f32 %v2432_v37, %v573_v62  ;;  %v823_v8 = vrot.slane %v821_v63, 1  ;;  %2925 = vmatpush3.bf16.msra.mxu0 %v3140_v24  ;;  %v723_v11 = vor.u32 %v721_v51, %v3773_v43  ;;  %v3144_v37 = vld [vmem:[#allocation7 + $0x98] sm:$0xff]   ;;  %2700 = vmatprep.subr.bf16.mxu1 %v3149_v9  ;;  %v3162_v9 = vld [vmem:[#allocation7 + $0x8] sm:$0xff]  }
 0x162   : > { %v732_v39 = vshrl.u32 %v667_v1, 16  ;;  %v735_v12 = vshll.u32 %v667_v1, 16  ;;  %1234 = vmatprep.mubr.bf16.mxu1 %v3782_v47  ;;  %v828_v25 = vrot.slane %v826_v2, 1  ;;  %2926 = vmatprep.subr.bf16.mxu0 %v3142_v60  ;;  %v915_v15 = vrot.slane %v3770_v50, 1 }
 0x163   : > { %v666_v4 = vpack.c.bf16 %v655_v5, %v654_v58  ;;  %1235 = vmatmul.mubr.bf16.gmra.mxu1 %v3709_v40  ;;  %v824_v13 = vor.u32 %v823_v8, %v819_v7  ;;  %v916_v16 = vrot.slane %v775_v49, 1  ;;  %v3791_v17 = vsel %vm3652_vm14, 0, %v716_v0  ;;  %v3148_v0 = vld [vmem:[#allocation7 + $0x88] sm:$0xff]  }
 0x164   : > { %v3793_v18 = vrot.slane %v732_v39, 7  ;;  %v776_v19 = vsel %vm3652_vm14, %v3716_v57, 0  ;;  %v918_v20 = vrot.slane %v3760_v38, 1  ;;  %v833_v30 = vshll.u32 %v3770_v50, 16  ;;  %2701 = vmatpush3.bf16.msra.mxu1 %v3151_v23  ;;  %v3160_v5 = vld [vmem:[#allocation7 + $0x48] sm:$0xff]   ;;  %v3871_v23 = vld [vmem:[#allocation7 + $0x238] sm:$0xff]  }
 0x165   : > { %v725_v48 = vshrl.u32 %v666_v4, 16  ;;  %v728_v22 = vshll.u32 %v666_v4, 16  ;;  %v3800_v46 = vsel %vm781_vm15, %v824_v13, %v828_v25  ;;  %v3803_v24 = vsel %vm902_vm12, %v915_v15, %v916_v16  ;;  %2927 = vmatpush3.bf16.msra.mxu0 %v3142_v60  ;;  %2702 = vmatprep.subr.bf16.mxu1 %v3154_v33  ;;  %v3150_v4 = vld [vmem:[#allocation7 + $0x80] sm:$0xff]  }
 0x166   : > { %v737_v26 = vor.u32 %v735_v12, %v3793_v18  ;;  %1242 = vmatprep.mubr.bf16.mxu1 %v3800_v46  ;;  %2909 = vmatmul.mubr.bf16.gmra.mxu0 %v3803_v24  ;;  %v919_v57 = vrot.slane %v776_v19, 1  ;;  %v838_v31 = vshll.u32 %v775_v49, 16  ;;  %v3811_v34 = vsel %vm3652_vm14, 0, %v723_v11  ;;  %v3166_v11 = vld [vmem:[#allocation7 + $0x40] sm:$0xff]  }
 0x167   : > { %v727_v35 = vrot.slane %v725_v48, 7  ;;  %v3815_v36 = vsel %vm3652_vm14, %v713_v56, 0  ;;  %v921_v41 = vrot.slane %v3791_v17, 1  ;;  %2928 = vmatprep.subr.bf16.mxu0 %v3144_v37  ;;  %v831_v51 = vshrl.u32 %v3770_v50, 16 }
 0x168   : > { %v3820_v44 = vsel %vm3652_vm14, 0, %v737_v26  ;;  %v3823_v45 = vsel %vm902_vm12, %v918_v20, %v919_v57  ;;  %v835_v29 = vrot.slane %v833_v30, 1  ;;  %v840_v56 = vrot.slane %v838_v31, 1  ;;  %2703 = vmatpush3.bf16.msra.mxu1 %v3156_v53 }
 0x169   : > { %v730_v58 = vor.u32 %v728_v22, %v727_v35  ;;  %2912 = vmatprep.mubr.bf16.mxu0 %v3823_v45  ;;  %v922_v59 = vrot.slane %v3815_v36, 1  ;;  %2929 = vmatpush3.bf16.msra.mxu0 %v3144_v37  ;;  %v845_v60 = vshll.u32 %v3760_v38, 16  ;;  %v850_v61 = vshll.u32 %v776_v19, 16  ;;  %v3168_v19 = vld [vmem:[#allocation7] sm:$0xff]   ;;  %v3152_v22 = vld [vmem:[#allocation7 + $0x1f8] sm:$0xff]  }
 0x16a   : > { %v836_v27 = vor.u32 %v835_v29, %v831_v51  ;;  %2930 = vmatprep.subr.bf16.mxu0 %v3146_v42  ;;  %v3832_v62 = vsel %vm3652_vm14, %v3773_v43, 0  ;;  %v924_v63 = vrot.slane %v3811_v34, 1  ;;  %v843_v49 = vshrl.u32 %v3760_v38, 16  ;;  %2704 = vmatprep.subr.bf16.mxu1 %v3160_v5  ;;  %v3155_v5 = vld [vmem:[#allocation7 + $0x1f0] sm:$0xff]  }
 0x16b   : > { %v3837_v1 = vsel %vm3652_vm14, 0, %v730_v58  ;;  %1243 = vmatmul.mubr.bf16.gmra.mxu1 %v3704_v28  ;;  %v3841_v2 = vsel %vm902_vm12, %v921_v41, %v922_v59  ;;  %v847_v3 = vrot.slane %v845_v60, 1  ;;  %v925_v7 = vrot.slane %v3832_v62, 1 }
 0x16c   : > { %v3845_v43 = vsel %vm781_vm15, %v836_v27, %v840_v56  ;;  %v3850_v8 = vsel %vm3652_vm14, %v727_v35, 0  ;;  %v852_v39 = vrot.slane %v850_v61, 1  ;;  %v998_v25 = vrot.slane %v3837_v1, 1  ;;  %2705 = vmatpush3.bf16.msra.mxu1 %v3162_v9 }
 0x16d   : > { %1250 = vmatprep.mubr.bf16.mxu1 %v3845_v43  ;;  %2931 = vmatpush3.bf16.msra.mxu0 %v3146_v42  ;;  %v3855_v12 = vsel %vm902_vm12, %v924_v63, %v925_v7  ;;  %v848_v13 = vor.u32 %v847_v3, %v843_v49  ;;  %v999_v15 = vrot.slane %v3850_v8, 1  ;;  %v3863_v16 = vsel %vm3652_vm14, 0, %v3745_v14  ;;  %v3153_v63 = vld [vmem:[#allocation7 + $0x1b8] sm:$0xff]   ;;  %v3157_v7 = vld [vmem:[#allocation7 + $0x1b0] sm:$0xff]  }
 0x16e   : > { %2913 = vmatmul.mubr.bf16.gmra.mxu0 %v3841_v2  ;;  %2932 = vmatprep.subr.bf16.mxu0 %v3148_v0  ;;  %v857_v37 = vshll.u32 %v3791_v17, 16  ;;  %v3869_v20 = vsel %vm3652_vm14, %v3677_v55, 0  ;;  %v903_v48 = vrot.slane %v3863_v16, 1  ;;  %v855_v14 = vshrl.u32 %v3791_v17, 16 }
 0x16f   : > { %2916 = vmatprep.mubr.bf16.mxu0 %v3855_v12  ;;  %2706 = vmatprep.subr.bf16.mxu1 %v3166_v11  ;;  %v3877_v26 = vsel %vm781_vm15, %v848_v13, %v852_v39  ;;  %v3880_v57 = vsel %vm902_vm12, %v998_v25, %v999_v15  ;;  %v862_v55 = vshll.u32 %v3815_v36, 16  ;;  %v904_v31 = vrot.slane %v3869_v20, 1  ;;  %v3158_v25 = vld [vmem:[#allocation7 + $0x1e8] sm:$0xff]  }
 0x170   : > { %v859_v30 = vrot.slane %v857_v37, 1  ;;  %2707 = vmatpush3.bf16.msra.mxu1 %v3168_v19  ;;  %v780_v42 = vsel %vm3652_vm14, %v3793_v18, 0  ;;  %v1727_v33 = vshrl.u32 %v3820_v44, 16  ;;  %v1729_v35 = vshll.u32 %v3820_v44, 16  ;;  %v3161_v37 = vld [vmem:[#allocation7 + $0x1e0] sm:$0xff]  }
 0x171   : > { %2933 = vmatpush3.bf16.msra.mxu0 %v3148_v0  ;;  %2952 = vmatprep.subr.bf16.mxu1 %v3871_v23  ;;  %v905_v36 = vsel %vm902_vm12, %v903_v48, %v904_v31  ;;  %v869_v41 = vshll.u32 %v3811_v34, 16  ;;  %v1734_v51 = vshll.u32 %v780_v42, 16  ;;  %v1741_v29 = vrot.slane %v3820_v44, 1  ;;  %v3163_v19 = vld [vmem:[#allocation7 + $0x1a0] sm:$0xff]  }
 0x172   : > { %2934 = vmatprep.subr.bf16.mxu0 %v3150_v4  ;;  %v860_v32 = vor.u32 %v859_v30, %v855_v14  ;;  %v864_v18 = vrot.slane %v862_v55, 1  ;;  %v1731_v53 = vrot.slane %v1729_v35, 1  ;;  %v1742_v58 = vrot.slane %v780_v42, 1  ;;  %v3164_v30 = vld [vmem:[#allocation7 + $0x1d8] sm:$0xff]   ;;  %v3167_v42 = vld [vmem:[#allocation7 + $0x1d0] sm:$0xff]  }
 0x173   : > { %1251 = vmatmul.mubr.bf16.gmra.mxu1 %v3770_v50  ;;  %v1736_v56 = vrot.slane %v1734_v51, 1  ;;  %v867_v27 = vshrl.u32 %v3811_v34, 16  ;;  %v871_v0 = vrot.slane %v869_v41, 1  ;;  %v874_v49 = vshll.u32 %v3832_v62, 16  ;;  %v3165_v55 = vld [vmem:[#allocation7 + $0x198] sm:$0xff]   ;;  %v3170_v51 = vld [vmem:[#allocation7 + $0x1c8] sm:$0xff]  }
 0x174   : > { %1258 = vmatprep.mubr.bf16.mxu1 %v3877_v26  ;;  %v1732_v59 = vor.u32 %v1731_v53, %v1727_v33  ;;  %v3896_v60 = vsel %vm902_vm12, %v1741_v29, %v1742_v58  ;;  %v3901_v61 = vsel %vm781_vm15, %v860_v32, %v864_v18  ;;  %v986_v39 = vshll.u32 %v3837_v1, 16  ;;  %v3171_v18 = vld [vmem:[#allocation7 + $0x188] sm:$0xff]   ;;  %v3172_v53 = vld [vmem:[#allocation7 + $0x1c0] sm:$0xff]   ;;  %v3175_v58 = vld [vmem:[#allocation7 + $0x230] sm:$0xff]  }
 0x175   : > { %2935 = vmatpush3.bf16.msra.mxu0 %v3150_v4  ;;  %v872_v9 = vor.u32 %v871_v0, %v867_v27  ;;  %v876_v11 = vrot.slane %v874_v49, 1  ;;  %v3159_v4 = vld [vmem:[#allocation7 + $0x1a8] sm:$0xff]   ;;  %v984_v13 = vshrl.u32 %v3837_v1, 16  ;;  %v991_v15 = vshll.u32 %v3850_v8, 16 }
 0x176   : > { %2917 = vmatmul.mubr.bf16.gmra.mxu0 %v3880_v57  ;;  %2772 = vmatprep.subr.bf16.mxu0 %v3152_v22  ;;  %v3905_v3 = vsel %vm781_vm15, %v1732_v59, %v1736_v56  ;;  %v785_v22 = vshll.u32 %v3863_v16, 16  ;;  %v783_v33 = vshrl.u32 %v3863_v16, 16  ;;  %v790_v35 = vshll.u32 %v3869_v20, 16  ;;  %v3174_v20 = vld [vmem:[#allocation7 + $0x180] sm:$0xff]   ;;  %v3176_v56 = vld [vmem:[#allocation7 + $0x228] sm:$0xff]  }
 0x177   : > { %2936 = vmatprep.mubr.bf16.mxu0 %v905_v36  ;;  %v3913_v62 = vsel %vm781_vm15, %v872_v9, %v876_v11  ;;  %v993_v14 = vrot.slane %v991_v15, 1  ;;  %v3169_v36 = vld [vmem:[#allocation7 + $0x190] sm:$0xff]   ;;  %v3177_v59 = vld [vmem:[#allocation7 + $0x220] sm:$0xff]  }
 0x178   : > { %v787_v31 = vrot.slane %v785_v22, 1  ;;  %v792_v29 = vrot.slane %v790_v35, 1 }
 0x17a   : > { %v788_v41 = vor.u32 %v787_v31, %v783_v33 }
 0x17b   : > { %1259 = vmatmul.mubr.bf16.gmra.mxu1 %v3760_v38 }
 0x17c   : > { %1266 = vmatprep.mubr.bf16.mxu1 %v3901_v61  ;;  %v793_v32 = vsel %vm781_vm15, %v788_v41, %v792_v29 }
 0x17e   : > { %2937 = vmatmul.mubr.bf16.vlgmr.msra.gmra.mxu0 %v3686_v6  ;;  %v988_v6 = vrot.slane %v986_v39, 1 }
 0x17f   : > { %2940 = vmatprep.mubr.bf16.mxu0 %v3738_v10  ;;  %2773 = vmatpush3.bf16.msra.mxu0 %v3153_v63 }
 0x180   : > { %2774 = vmatprep.subr.bf16.mxu0 %v3155_v5  ;;  %v989_v48 = vor.u32 %v988_v6, %v984_v13 }
 0x182   : > { %v3923_v8 = vsel %vm781_vm15, %v989_v48, %v993_v14 }
 0x183   : > { %1267 = vmatmul.mubr.bf16.gmra.mxu1 %v3791_v17  ;;  %2775 = vmatpush3.bf16.msra.mxu0 %v3157_v7 }
 0x184   : > { %1274 = vmatprep.mubr.bf16.mxu1 %v3913_v62  ;;  %2776 = vmatprep.subr.bf16.mxu0 %v3158_v25 }
 0x186   : > { %2941 = vmatmul.mubr.bf16.gmra.mxu0 %v3755_v21 }
 0x187   : > { %2944 = vmatprep.mubr.bf16.mxu0 %v3803_v24  ;;  %2777 = vmatpush3.bf16.msra.mxu0 %v3159_v4 }
 0x188   : > { %2778 = vmatprep.subr.bf16.mxu0 %v3161_v37 }
 0x18b   : > { %1275 = vmatmul.mubr.bf16.gmra.mxu1 %v3811_v34  ;;  %2779 = vmatpush3.bf16.msra.mxu0 %v3163_v19 }
 0x18c   : > { %1282 = vmatprep.mubr.bf16.mxu1 %v3923_v8  ;;  %2780 = vmatprep.subr.bf16.mxu0 %v3164_v30 }
 0x18e   : > { %2945 = vmatmul.mubr.bf16.gmra.mxu0 %v3823_v45 }
 0x18f   : > { %2948 = vmatprep.mubr.bf16.mxu0 %v3841_v2  ;;  %2781 = vmatpush3.bf16.msra.mxu0 %v3165_v55 }
 0x190   : > { %2782 = vmatprep.subr.bf16.mxu0 %v3167_v42 }
 0x193   : > { %1283 = vmatmul.mubr.bf16.gmra.mxu1 %v3837_v1  ;;  %2783 = vmatpush3.bf16.msra.mxu0 %v3169_v36 }
 0x194   : > { %1564 = vmatprep.mubr.bf16.mxu1 %v793_v32  ;;  %2784 = vmatprep.subr.bf16.mxu0 %v3170_v51 }
 0x196   : > { %2949 = vmatmul.mubr.bf16.gmra.mxu0 %v3855_v12 }
 0x197   : > { %2785 = vmatpush3.bf16.msra.mxu0 %v3171_v18  ;;  %1969 = vmatprep.mubr.bf16.mxu0 %v3782_v47 }
 0x198   : > { %2786 = vmatprep.subr.bf16.mxu0 %v3172_v53 }
 0x19b   : > { %1565 = vmatmul.mubr.bf16.vlgmr.msra.gmra.mxu1 %v3863_v16  ;;  %2787 = vmatpush3.bf16.msra.mxu0 %v3174_v20  ;;  %v3178_v16 = vld [vmem:[#allocation7 + $0x218] sm:$0xff]  }
 0x19c   : > { %2953 = vmatpush3.bf16.msra.mxu1 %v3871_v23  ;;  %1572 = vmatprep.mubr.bf16.mxu1 %v3713_v52  ;;  %v3179_v52 = vld [vmem:[#allocation7 + $0x210] sm:$0xff]   ;;  %v3180_v23 = vld [vmem:[#allocation7 + $0x208] sm:$0xff]  }
 0x19d   : > { %2954 = vmatprep.subr.bf16.mxu1 %v3175_v58 }
 0x19e   : > { %1970 = vmatmul.mubr.bf16.vlgmr.msra.gmra.mxu0 %v3709_v40 }
 0x19f   : > { %1977 = vmatprep.mubr.bf16.mxu0 %v3800_v46 }
 0x1a0   : > { %2955 = vmatpush3.bf16.msra.mxu1 %v3175_v58 }
 0x1a1   : > { %2956 = vmatprep.subr.bf16.mxu1 %v3176_v56 }
 0x1a3   : > { %1573 = vmatmul.mubr.bf16.gmra.mxu1 %v3675_v54  ;;  %v3181_v54 = vld [vmem:[#allocation7 + $0x200] sm:$0xff]  }
 0x1a4   : > { %1580 = vmatprep.mubr.bf16.mxu1 %v3782_v47  ;;  %2957 = vmatpush3.bf16.msra.mxu1 %v3176_v56 }
 0x1a5   : > { %2958 = vmatprep.subr.bf16.mxu1 %v3177_v59 }
 0x1a6   : > { %1978 = vmatmul.mubr.bf16.gmra.mxu0 %v3704_v28 }
 0x1a7   : > { %1985 = vmatprep.mubr.bf16.mxu0 %v3845_v43 }
 0x1a8   : > { %2959 = vmatpush3.bf16.msra.mxu1 %v3177_v59 }
 0x1a9   : > { %2960 = vmatprep.subr.bf16.mxu1 %v3178_v16 }
 0x1ab   : > { %1581 = vmatmul.mubr.bf16.gmra.mxu1 %v3709_v40 }
 0x1ac   : > { %1588 = vmatprep.mubr.bf16.mxu1 %v3800_v46  ;;  %2961 = vmatpush3.bf16.msra.mxu1 %v3178_v16 }
 0x1ad   : > { %2962 = vmatprep.subr.bf16.mxu1 %v3179_v52 }
 0x1ae   : > { %1986 = vmatmul.mubr.bf16.gmra.mxu0 %v3770_v50 }
 0x1af   : > { %1993 = vmatprep.mubr.bf16.mxu0 %v3877_v26 }
 0x1b0   : > { %2963 = vmatpush3.bf16.msra.mxu1 %v3179_v52 }
 0x1b1   : > { %2964 = vmatprep.subr.bf16.mxu1 %v3180_v23 }
 0x1b3   : > { %1589 = vmatmul.mubr.bf16.gmra.mxu1 %v3704_v28 }
 0x1b4   : > { %1596 = vmatprep.mubr.bf16.mxu1 %v3845_v43  ;;  %2965 = vmatpush3.bf16.msra.mxu1 %v3180_v23 }
 0x1b5   : > { %2966 = vmatprep.subr.bf16.mxu1 %v3181_v54 }
 0x1b6   : > { %1994 = vmatmul.mubr.bf16.gmra.mxu0 %v3760_v38 }
 0x1b7   : > { %2001 = vmatprep.mubr.bf16.mxu0 %v3901_v61 }
 0x1b8   : > { %2967 = vmatpush3.bf16.msra.mxu1 %v3181_v54 }
 0x1bb   : > { %1597 = vmatmul.mubr.bf16.gmra.mxu1 %v3770_v50 }
 0x1bc   : > { %1604 = vmatprep.mubr.bf16.mxu1 %v3877_v26 }
 0x1be   : > { %2002 = vmatmul.mubr.bf16.gmra.mxu0 %v3791_v17 }
 0x1bf   : > { %2009 = vmatprep.mubr.bf16.mxu0 %v3913_v62 }
 0x1c3   : > { %1605 = vmatmul.mubr.bf16.gmra.mxu1 %v3760_v38 }
 0x1c4   : > { %1612 = vmatprep.mubr.bf16.mxu1 %v3901_v61 }
 0x1c6   : > { %2010 = vmatmul.mubr.bf16.gmra.mxu0 %v3811_v34 }
 0x1c7   : > { %2017 = vmatprep.mubr.bf16.mxu0 %v3923_v8 }
 0x1cb   : > { %1613 = vmatmul.mubr.bf16.gmra.mxu1 %v3791_v17 }
 0x1cc   : > { %1620 = vmatprep.mubr.bf16.mxu1 %v3913_v62 }
 0x1ce   : > { %2018 = vmatmul.mubr.bf16.gmra.mxu0 %v3837_v1 }
 0x1cf   : > { %2025 = vmatprep.mubr.bf16.mxu0 %v3905_v3 }
 0x1d3   : > { %1621 = vmatmul.mubr.bf16.gmra.mxu1 %v3811_v34 }
 0x1d4   : > { %2968 = vmatprep.mubr.bf16.mxu1 %v3738_v10 }
 0x1d6   : > { %2026 = vmatmul.mubr.bf16.gmra.mxu0 %v3820_v44 }
 0x1db   : > { %2969 = vmatmul.mubr.bf16.vlgmr.msra.gmra.mxu1 %v3755_v21 }
 0x1dc   : > { %2972 = vmatprep.mubr.bf16.mxu1 %v3803_v24 }
 0x1e3   : > { %2973 = vmatmul.mubr.bf16.gmra.mxu1 %v3823_v45 }
 0x1e4   : > { %2976 = vmatprep.mubr.bf16.mxu1 %v3841_v2 }
 0x1eb   : > { %2977 = vmatmul.mubr.bf16.gmra.mxu1 %v3855_v12 }
 0x1ec   : > { %2980 = vmatprep.mubr.bf16.mxu1 %v3880_v57 }
 0x1f3   : > { %2981 = vmatmul.mubr.bf16.gmra.mxu1 %v3896_v60 }
 0x213   : > { %v2628_v28 = vpop.f32.mrf.mxu1 }
 0x215   : > { %v2629_v40 = vpop.f32.mrf.mxu1 }
 0x216   : > { %v2630_v38 = vadd.f32 %v2629_v40, %v2628_v28 }
 0x217   : > { %v2631_v50 = vpop.f32.mrf.mxu1 }
 0x218   : > { %v2906_v10 = vpop.f32.mrf.mxu0 }
 0x219   : > { %v2632_v17 = vpop.f32.mrf.mxu1 }
 0x21a   : > { %v1325_v47 = vpop.f32.mrf.mxu0  ;;  %v2633_v46 = vadd.f32 %v2632_v17, %v2631_v50 }
 0x21b   : > { %v3973_v21 = vadd.f32 %v2630_v38, %v1325_v47 }
 0x21c   : > { %v2907_v24 = vpop.f32.mrf.mxu0 }
 0x21e   : > { %v1328_v34 = vpop.f32.mrf.mxu0 }
 0x21f   : > { %v3975_v44 = vadd.f32 %v2633_v46, %v1328_v34 }
 0x223   : > { %v2634_v45 = vpop.f32.mrf.mxu1 }
 0x225   : > { %v2635_v1 = vpop.f32.mrf.mxu1 }
 0x226   : > { %v2636_v2 = vadd.f32 %v2635_v1, %v2634_v45  ;;  %v2910_v43 = vpop.f32.mrf.mxu0 }
 0x227   : > { %v2637_v12 = vpop.f32.mrf.mxu1 }
 0x228   : > { %v3977_v26 = vadd.f32 %v2906_v10, %v2636_v2  ;;  %v1341_v57 = vpop.f32.mrf.mxu0 }
 0x229   : > { %v2638_v60 = vpop.f32.mrf.mxu1 }
 0x22a   : > { %v2639_v27 = vadd.f32 %v2638_v60, %v2637_v12  ;;  %v2911_v61 = vpop.f32.mrf.mxu0 }
 0x22b   : > { %v2640_v63 = vpop.f32.mrf.mxu1 }
 0x22c   : > { %v3979_v0 = vadd.f32 %v2907_v24, %v2639_v27  ;;  %v1344_v49 = vpop.f32.mrf.mxu0 }
 0x22d   : > { %v2641_v3 = vpop.f32.mrf.mxu1 }
 0x22e   : > { %v2642_v5 = vadd.f32 %v2641_v3, %v2640_v63  ;;  %v2914_v7 = vpop.f32.mrf.mxu0 }
 0x22f   : > { %v2643_v9 = vpop.f32.mrf.mxu1 }
 0x230   : > { %v3981_v11 = vadd.f32 %v2642_v5, %v1341_v57  ;;  %v1357_v39 = vpop.f32.mrf.mxu0 }
 0x231   : > { %v2644_v25 = vpop.f32.mrf.mxu1 }
 0x232   : > { %v2645_v62 = vadd.f32 %v2644_v25, %v2643_v9  ;;  %v2915_v4 = vpop.f32.mrf.mxu0 }
 0x233   : > { %v2646_v13 = vpop.f32.mrf.mxu1 }
 0x234   : > { %v3983_v6 = vadd.f32 %v2645_v62, %v1344_v49  ;;  %v1360_v15 = vpop.f32.mrf.mxu0 }
 0x235   : > { %v2647_v37 = vpop.f32.mrf.mxu1 }
 0x236   : > { %v2648_v19 = vadd.f32 %v2647_v37, %v2646_v13  ;;  %v2918_v48 = vpop.f32.mrf.mxu0 }
 0x237   : > { %v2649_v14 = vpop.f32.mrf.mxu1 }
 0x238   : > { %v3985_v22 = vadd.f32 %v2910_v43, %v2648_v19  ;;  %v1373_v30 = vpop.f32.mrf.mxu0 }
 0x239   : > { %v2650_v8 = vpop.f32.mrf.mxu1 }
 0x23a   : > { %v2651_v55 = vadd.f32 %v2650_v8, %v2649_v14  ;;  %v2919_v31 = vpop.f32.mrf.mxu0 }
 0x23b   : > { %v2652_v42 = vpop.f32.mrf.mxu1 }
 0x23c   : > { %v3987_v33 = vadd.f32 %v2911_v61, %v2651_v55  ;;  %v1376_v35 = vpop.f32.mrf.mxu0 }
 0x23d   : > { %v2653_v36 = vpop.f32.mrf.mxu1 }
 0x23e   : > { %v2654_v41 = vadd.f32 %v2653_v36, %v2652_v42  ;;  %v3989_v51 = vpop.f32.mrf.mxu0 }
 0x23f   : > { %v2655_v29 = vpop.f32.mrf.mxu1 }
 0x240   : > { %v3991_v32 = vadd.f32 %v2654_v41, %v1357_v39  ;;  %v1663_v18 = vpop.f32.mrf.mxu0 }
 0x241   : > { %v2656_v53 = vpop.f32.mrf.mxu1 }
 0x242   : > { %v2657_v20 = vadd.f32 %v2656_v53, %v2655_v29  ;;  %v3993_v58 = vpop.f32.mrf.mxu0 }
 0x243   : > { %v2658_v56 = vpop.f32.mrf.mxu1 }
 0x244   : > { %v3995_v59 = vadd.f32 %v2657_v20, %v1360_v15  ;;  %v1666_v16 = vpop.f32.mrf.mxu0 }
 0x245   : > { %v2659_v52 = vpop.f32.mrf.mxu1 }
 0x246   : > { %v2660_v23 = vadd.f32 %v2659_v52, %v2658_v56  ;;  %v3997_v54 = vpop.f32.mrf.mxu0 }
 0x247   : > { %v2661_v28 = vpop.f32.mrf.mxu1 }
 0x248   : > { %v3999_v40 = vadd.f32 %v2914_v7, %v2660_v23  ;;  %v4001_v38 = vpop.f32.mrf.mxu0 }
 0x249   : > { %v2662_v10 = vpop.f32.mrf.mxu1 }
 0x24a   : > { %v2663_v50 = vadd.f32 %v2662_v10, %v2661_v28  ;;  %v4003_v47 = vpop.f32.mrf.mxu0 }
 0x24b   : > { %v2664_v17 = vpop.f32.mrf.mxu1 }
 0x24c   : > { %v4005_v46 = vadd.f32 %v2915_v4, %v2663_v50  ;;  %v4007_v24 = vpop.f32.mrf.mxu0 }
 0x24d   : > { %v2665_v34 = vpop.f32.mrf.mxu1 }
 0x24e   : > { %v2666_v45 = vadd.f32 %v2665_v34, %v2664_v17  ;;  %v4009_v1 = vpop.f32.mrf.mxu0 }
 0x24f   : > { %v2667_v2 = vpop.f32.mrf.mxu1 }
 0x250   : > { %v4011_v43 = vadd.f32 %v2666_v45, %v1373_v30  ;;  %v4013_v12 = vpop.f32.mrf.mxu0 }
 0x251   : > { %v2668_v57 = vpop.f32.mrf.mxu1 }
 0x252   : > { %v2669_v60 = vadd.f32 %v2668_v57, %v2667_v2  ;;  %v4015_v27 = vpop.f32.mrf.mxu0 }
 0x253   : > { %v2670_v61 = vpop.f32.mrf.mxu1 }
 0x254   : > { %v4017_v63 = vadd.f32 %v2669_v60, %v1376_v35  ;;  %v4019_v49 = vpop.f32.mrf.mxu0 }
 0x255   : > { %v2671_v3 = vpop.f32.mrf.mxu1 }
 0x256   : > { %v2672_v5 = vadd.f32 %v2671_v3, %v2670_v61  ;;  %v4021_v7 = vpop.f32.mrf.mxu0 }
 0x257   : > { %v2673_v9 = vpop.f32.mrf.mxu1 }
 0x258   : > { %v4023_v39 = vadd.f32 %v2918_v48, %v2672_v5  ;;  %v4025_v25 = vpop.f32.mrf.mxu0 }
 0x259   : > { %v2674_v62 = vpop.f32.mrf.mxu1 }
 0x25a   : > { %v2675_v4 = vadd.f32 %v2674_v62, %v2673_v9  ;;  %v4027_v13 = vpop.f32.mrf.mxu0 }
 0x25b   : > { %v2708_v15 = vpop.f32.mrf.mxu1 }
 0x25c   : > { %v4029_v37 = vadd.f32 %v2919_v31, %v2675_v4  ;;  %v4031_v19 = vpop.f32.mrf.mxu0 }
 0x25d   : > { %v2709_v14 = vpop.f32.mrf.mxu1 }
 0x25e   : > { %v2710_v30 = vadd.f32 %v2709_v14, %v2708_v15  ;;  %v4033_v8 = vpop.f32.mrf.mxu0 }
 0x25f   : > { %v2711_v55 = vpop.f32.mrf.mxu1 }
 0x260   : > { %v1567_v42 = vadd.f32 %v2710_v30, %v3973_v21  ;;  %v4036_v48 = vpop.f32.mrf.mxu0 }
 0x261   : > { %v2712_v35 = vpop.f32.mrf.mxu1 }
 0x262   : > { %v2713_v36 = vadd.f32 %v2712_v35, %v2711_v55  ;;  %v4038_v41 = vpop.f32.mrf.mxu0  ;;  %v4040_v29 = vadd.f32 %v1663_v18, %v1567_v42 }
 0x263   : > { %v2714_v53 = vpop.f32.mrf.mxu1 }
 0x264   : > { %v1570_v31 = vadd.f32 %v2713_v36, %v3975_v44  ;;  %v4043_v20 = vpop.f32.mrf.mxu0 }
 0x265   : > { %v2715_v56 = vpop.f32.mrf.mxu1 }
 0x266   : > { %v2716_v52 = vadd.f32 %v2715_v56, %v2714_v53  ;;  %v4045_v23 = vpop.f32.mrf.mxu0  ;;  %v4047_v28 = vadd.f32 %v1666_v16, %v1570_v31 }
 0x267   : > { %v2717_v21 = vpop.f32.mrf.mxu1 }
 0x268   : > { %v1575_v10 = vadd.f32 %v2716_v52, %v3977_v26  ;;  %v4050_v50 = vpop.f32.mrf.mxu0 }
 0x269   : > { %v2718_v17 = vpop.f32.mrf.mxu1 }
 0x26a   : > { %v2719_v34 = vadd.f32 %v2718_v17, %v2717_v21  ;;  %v4052_v18 = vpop.f32.mrf.mxu0  ;;  %v4055_v45 = vadd.f32 %v3989_v51, %v1575_v10 }
 0x26b   : > { %v2720_v44 = vpop.f32.mrf.mxu1 }
 0x26c   : > { %v1578_v2 = vadd.f32 %v2719_v34, %v3979_v0  ;;  %v4058_v57 = vpop.f32.mrf.mxu0 }
 0x26d   : > { %v2721_v60 = vpop.f32.mrf.mxu1 }
 0x26e   : > { %v2722_v16 = vadd.f32 %v2721_v60, %v2720_v44  ;;  %v4060_v61 = vpop.f32.mrf.mxu0  ;;  %v4063_v26 = vadd.f32 %v3993_v58, %v1578_v2 }
 0x26f   : > { %v2723_v3 = vpop.f32.mrf.mxu1 }
 0x270   : > { %v1583_v5 = vadd.f32 %v2722_v16, %v3981_v11  ;;  %v4066_v9 = vpop.f32.mrf.mxu0 }
 0x271   : > { %v2724_v62 = vpop.f32.mrf.mxu1 }
 0x272   : > { %v2725_v51 = vadd.f32 %v2724_v62, %v2723_v3  ;;  %v4068_v4 = vpop.f32.mrf.mxu0  ;;  %v4071_v0 = vadd.f32 %v4001_v38, %v1583_v5 }
 0x273   : > { %v2726_v15 = vpop.f32.mrf.mxu1 }
 0x274   : > { %v1586_v14 = vadd.f32 %v2725_v51, %v3983_v6  ;;  %v4074_v30 = vpop.f32.mrf.mxu0 }
 0x275   : > { %v2727_v55 = vpop.f32.mrf.mxu1 }
 0x276   : > { %v2728_v58 = vadd.f32 %v2727_v55, %v2726_v15  ;;  %v4076_v42 = vpop.f32.mrf.mxu0  ;;  %v4079_v11 = vadd.f32 %v4007_v24, %v1586_v14 }
 0x277   : > { %v2729_v35 = vpop.f32.mrf.mxu1 }
 0x278   : > { %v1591_v36 = vadd.f32 %v2728_v58, %v3985_v22  ;;  %v4082_v53 = vpop.f32.mrf.mxu0 }
 0x279   : > { %v2730_v31 = vpop.f32.mrf.mxu1 }
 0x27a   : > { %v2731_v38 = vadd.f32 %v2730_v31, %v2729_v35  ;;  %v4084_v56 = vpop.f32.mrf.mxu0  ;;  %v4087_v6 = vadd.f32 %v3997_v54, %v1591_v36 }
 0x27b   : > { %v2732_v52 = vpop.f32.mrf.mxu1 }
 0x27c   : > { %v1594_v21 = vadd.f32 %v2731_v38, %v3987_v33  ;;  %v4090_v10 = vpop.f32.mrf.mxu0 }
 0x27d   : > { %v2733_v17 = vpop.f32.mrf.mxu1 }
 0x27e   : > { %v2734_v24 = vadd.f32 %v2733_v17, %v2732_v52  ;;  %v4092_v34 = vpop.f32.mrf.mxu0  ;;  %v4095_v22 = vadd.f32 %v4003_v47, %v1594_v21 }
 0x27f   : > { %v2735_v44 = vpop.f32.mrf.mxu1 }
 0x280   : > { %v1599_v2 = vadd.f32 %v2734_v24, %v3991_v32  ;;  %v4098_v60 = vpop.f32.mrf.mxu0 }
 0x281   : > { %v2736_v16 = vpop.f32.mrf.mxu1 }
 0x282   : > { %v2737_v54 = vadd.f32 %v2736_v16, %v2735_v44  ;;  %v4100_v3 = vpop.f32.mrf.mxu0  ;;  %v4103_v33 = vadd.f32 %v4013_v12, %v1599_v2 }
 0x283   : > { %v2738_v5 = vpop.f32.mrf.mxu1 }
 0x284   : > { %v1602_v62 = vadd.f32 %v2737_v54, %v3995_v59  ;;  %v4106_v51 = vpop.f32.mrf.mxu0 }
 0x285   : > { %v2739_v15 = vpop.f32.mrf.mxu1 }
 0x286   : > { %v2740_v47 = vadd.f32 %v2739_v15, %v2738_v5  ;;  %v4108_v14 = vpop.f32.mrf.mxu0  ;;  %v4111_v32 = vadd.f32 %v4019_v49, %v1602_v62 }
 0x287   : > { %v2741_v55 = vpop.f32.mrf.mxu1 }
 0x288   : > { %v1607_v58 = vadd.f32 %v2740_v47, %v3999_v40  ;;  %v4114_v36 = vpop.f32.mrf.mxu0 }
 0x289   : > { %v2742_v35 = vpop.f32.mrf.mxu1 }
 0x28a   : > { %v2743_v12 = vadd.f32 %v2742_v35, %v2741_v55  ;;  %v4117_v31 = vadd.f32 %v4009_v1, %v1607_v58  ;;  %v4120_v21 = vpop.f32.mrf.mxu0  ;;  %v2790_v58 = vadd.f32 %v4036_v48, %v4033_v8  ;;  %v2793_v8 = vadd.f32 %v4043_v20, %v4038_v41 }
 0x28b   : > { %v2744_v59 = vpop.f32.mrf.mxu1 }
 0x28c   : > { %v1610_v38 = vadd.f32 %v2743_v12, %v4005_v46  ;;  %v4126_v2 = vpop.f32.mrf.mxu0  ;;  %v2799_v12 = vadd.f32 %v4058_v57, %v4052_v18  ;;  %v2808_v18 = vadd.f32 %v4082_v53, %v4076_v42 }
 0x28d   : > { %v2745_v52 = vpop.f32.mrf.mxu1 }
 0x28e   : > { %v2746_v17 = vadd.f32 %v2745_v52, %v2744_v59  ;;  %v4123_v49 = vadd.f32 %v4015_v27, %v1610_v38  ;;  %v4132_v62 = vpop.f32.mrf.mxu0 }
 0x28f   : > { %v2747_v24 = vpop.f32.mrf.mxu1 }
 0x290   : > { %v1615_v40 = vadd.f32 %v2746_v17, %v4011_v43  ;;  %v2796_v43 = vadd.f32 %v4050_v50, %v4045_v23  ;;  %v4143_v55 = vpop.f32.mrf.mxu0  ;;  %v4155_v23 = vld [vmem:[%s4292_s4] ss:$0 sm:$0xff] }
 0x291   : > { %v2748_v44 = vpop.f32.mrf.mxu1 }
 0x292   : > { %v2749_v16 = vadd.f32 %v2748_v44, %v2747_v24  ;;  %v4129_v1 = vadd.f32 %v4025_v25, %v1615_v40  ;;  %v2802_v44 = vadd.f32 %v4066_v9, %v4060_v61  ;;  %v2811_v61 = vadd.f32 %v4090_v10, %v4084_v56 }
 0x293   : > { %v2750_v54 = vpop.f32.mrf.mxu1 }
 0x294   : > { %v1618_v46 = vadd.f32 %v2749_v16, %v4017_v63 }
 0x295   : > { %v2751_v5 = vpop.f32.mrf.mxu1 }
 0x296   : > { %v4135_v15 = vadd.f32 %v4031_v19, %v1618_v46  ;;  %v4149_v19 = vpop.f32.mrf.mxu0  ;;  %v2752_v56 = vadd.f32 %v2751_v5, %v2750_v54  ;;  %v2823_v54 = vadd.f32 %v4126_v2, %v4120_v21  ;;  %v2817_v21 = vadd.f32 %v4106_v51, %v4100_v3 }
 0x297   : > { %v4137_v27 = vpop.f32.mrf.mxu1 }
 0x298   : > { %v4162_v57 = vpop.f32.mrf.mxu0 }
 0x299   : > { %v4139_v47 = vpop.f32.mrf.mxu1 }
 0x29a   : > { %v2830_v53 = vpop.f32.mrf.mxu0 }
 0x29b   : > { %v2970_v25 = vpop.f32.mrf.mxu1 }
 0x29c   : > { %v2077_v63 = vadd.f32 %v2970_v25, %v2796_v43 }
 0x29d   : > { %v2068_v35 = vpop.f32.mrf.mxu1 }
 0x29e   : > { %v2133_v59 = vadd.f32 %v2077_v63, %v4055_v45  ;;  %v2069_v38 = vadd.f32 %v2790_v58, %v2068_v35  ;;  %v2805_v63 = vadd.f32 %v4074_v30, %v4068_v4 }
 0x29f   : > { %v2971_v50 = vpop.f32.mrf.mxu1 }
 0x2a0   : > { %v2131_v48 = vadd.f32 %v2069_v38, %v4040_v29  ;;  %v2080_v52 = vadd.f32 %v2971_v50, %v2799_v12  ;;  %v2156_v45 = vadd.f32 %v4155_v23, %v2133_v59 }
 0x2a1   : > { %v2071_v17 = vpop.f32.mrf.mxu1 }
 0x2a2   : > { %v2134_v24 = vadd.f32 %v2080_v52, %v4063_v26  ;;  %v2072_v40 = vadd.f32 %v2793_v8, %v2071_v17  ;;  %v2154_v41 = vadd.f32 %v4155_v23, %v2131_v48  ;;  %v2172_v43 = vmax.f32 %v2156_v45, 0.0  ;;  %v2831_v52 = vpop.f32.mrf.mxu0 }
 0x2a3   : > { %v2974_v16 = vpop.f32.mrf.mxu1  ;;  %v2820_v48 = vadd.f32 %v4114_v36, %v4108_v14 }
 0x2a4   : > { %v2157_v29 = vadd.f32 %v4155_v23, %v2134_v24  ;;  %v2132_v20 = vadd.f32 %v2072_v40, %v4047_v28  ;;  %v2093_v46 = vadd.f32 %v2974_v16, %v2808_v18  ;;  %v2170_v12 = vmax.f32 %v2154_v41, 0.0  ;;  %v2833_v5 = vpop.f32.mrf.mxu0 }
 0x2a5   : > { %v2084_v42 = vpop.f32.mrf.mxu1 }
 0x2a6   : > { %v2173_v25 = vmax.f32 %v2157_v29, 0.0  ;;  %v2155_v58 = vadd.f32 %v4155_v23, %v2132_v20  ;;  %v2085_v26 = vadd.f32 %v2802_v44, %v2084_v42  ;;  %v2137_v9 = vadd.f32 %v2093_v46, %v4087_v6 }
 0x2a7   : > { %v2975_v35 = vpop.f32.mrf.mxu1 }
 0x2a8   : > { %v2555_v59 = vpack.c.bf16 %v2173_v25, %v2172_v43  ;;  %v2171_v28 = vmax.f32 %v2155_v58, 0.0  ;;  %v2135_v38 = vadd.f32 %v2085_v26, %v4071_v0  ;;  %v2096_v50 = vadd.f32 %v2975_v35, %v2811_v61 }
 0x2a9   : > { %v2087_v8 = vpop.f32.mrf.mxu1  ;;  %v2160_v6 = vadd.f32 %v4155_v23, %v2137_v9  ;;  %v2814_v0 = vadd.f32 %v4098_v60, %v4092_v34  ;;  %v1623_v34 = vadd.f32 %v2752_v56, %v4023_v39  ;;  %v2832_v43 = vadd.f32 %v2831_v52, %v2830_v53  ;;  %v2834_v39 = vpop.f32.mrf.mxu0 }
 0x2aa   : > { %2587 = vst [vmem:[%s4181_s8 + $0x8] sm:$0xff] %v2555_v59   ;;  %v2550_v4 = vpack.c.bf16 %v2171_v28, %v2170_v12  ;;  %v2088_v30 = vadd.f32 %v2805_v63, %v2087_v8  ;;  %v2138_v10 = vadd.f32 %v2096_v50, %v4095_v22  ;;  %v2158_v14 = vadd.f32 %v4155_v23, %v2135_v38 }
 0x2ab   : > { %v2978_v17 = vpop.f32.mrf.mxu1  ;;  %v2176_v60 = vmax.f32 %v2160_v6, 0.0  ;;  %v2835_v53 = vadd.f32 %v2834_v39, %v2833_v5 }
 0x2ac   : > { %2551 = vst [vmem:[%s4181_s8] sm:$0xff] %v2550_v4   ;;  %v2136_v36 = vadd.f32 %v2088_v30, %v4079_v11  ;;  %v2109_v18 = vadd.f32 %v2978_v17, %v2820_v48  ;;  %v2161_v45 = vadd.f32 %v4155_v23, %v2138_v10  ;;  %v2755_v11 = vadd.f32 %v4139_v47, %v4137_v27 }
 0x2ad   : > { %v2100_v24 = vpop.f32.mrf.mxu1  ;;  %v2174_v29 = vmax.f32 %v2158_v14, 0.0  ;;  %v2826_v27 = vadd.f32 %v4143_v55, %v4132_v62 }
 0x2ae   : > { %v2159_v40 = vadd.f32 %v4155_v23, %v2136_v36  ;;  %v2141_v22 = vadd.f32 %v2109_v18, %v4117_v31  ;;  %v2101_v44 = vadd.f32 %v2814_v0, %v2100_v24  ;;  %v2177_v16 = vmax.f32 %v2161_v45, 0.0 }
 0x2af   : > { %v2979_v41 = vpop.f32.mrf.mxu1  ;;  %v1626_v61 = vadd.f32 %v2755_v11, %v4029_v37  ;;  %v2829_v37 = vadd.f32 %v4162_v57, %v4149_v19 }
 0x2b0   : > { %v2175_v20 = vmax.f32 %v2159_v40, 0.0  ;;  %v2112_v46 = vadd.f32 %v2979_v41, %v2823_v54  ;;  %v2565_v2 = vpack.c.bf16 %v2177_v16, %v2176_v60  ;;  %v2139_v31 = vadd.f32 %v2101_v44, %v4103_v33 }
 0x2b1   : > { %v2103_v42 = vpop.f32.mrf.mxu1  ;;  %v2164_v58 = vadd.f32 %v4155_v23, %v2141_v22  ;;  %v1720_v33 = vadd.f32 %v4021_v7, %v1623_v34  ;;  %v1723_v8 = vadd.f32 %v4027_v13, %v1626_v61 }
 0x2b2   : > { %v2560_v25 = vpack.c.bf16 %v2175_v20, %v2174_v29  ;;  %v2142_v26 = vadd.f32 %v2112_v46, %v4123_v49  ;;  %2589 = vst [vmem:[%s4181_s8 + $0x18] sm:$0xff] %v2565_v2   ;;  %v2104_v47 = vadd.f32 %v2817_v21, %v2103_v42  ;;  %v2162_v9 = vadd.f32 %v4155_v23, %v2139_v31 }
 0x2b3   : > { %v2982_v63 = vpop.f32.mrf.mxu1  ;;  %v2180_v62 = vmax.f32 %v2164_v58, 0.0 }
 0x2b4   : > { %2588 = vst [vmem:[%s4181_s8 + $0x10] sm:$0xff] %v2560_v25   ;;  %v2165_v3 = vadd.f32 %v4155_v23, %v2142_v26  ;;  %v2125_v51 = vadd.f32 %v2982_v63, %v2832_v43  ;;  %v2140_v35 = vadd.f32 %v2104_v47, %v4111_v32  ;;  %v2178_v48 = vmax.f32 %v2162_v9, 0.0 }
 0x2b5   : > { %v2116_v49 = vpop.f32.mrf.mxu1 }
 0x2b6   : > { %v2181_v55 = vmax.f32 %v2165_v3, 0.0  ;;  %v2145_v12 = vadd.f32 %v2125_v51, %v1720_v33  ;;  %v2117_v59 = vadd.f32 %v2826_v27, %v2116_v49  ;;  %v2163_v28 = vadd.f32 %v4155_v23, %v2140_v35 }
 0x2b7   : > { %v2983_v7 = vpop.f32.mrf.mxu1 }
 0x2b8   : > { %v2575_v38 = vpack.c.bf16 %v2181_v55, %v2180_v62  ;;  %v2143_v50 = vadd.f32 %v2117_v59, %v4129_v1  ;;  %v2128_v32 = vadd.f32 %v2983_v7, %v2835_v53  ;;  %v2179_v52 = vmax.f32 %v2163_v28, 0.0 }
 0x2b9   : > { %v2119_v4 = vpop.f32.mrf.mxu1  ;;  %v2168_v30 = vadd.f32 %v4155_v23, %v2145_v12 }
 0x2ba   : > { %2591 = vst [vmem:[%s4181_s8 + $0x28] sm:$0xff] %v2575_v38   ;;  %v2146_v19 = vadd.f32 %v2128_v32, %v1723_v8  ;;  %v2120_v57 = vadd.f32 %v2829_v37, %v2119_v4  ;;  %v2570_v56 = vpack.c.bf16 %v2179_v52, %v2178_v48  ;;  %v2166_v6 = vadd.f32 %v4155_v23, %v2143_v50 }
 0x2bb   : > { %v2184_v10 = vmax.f32 %v2168_v30, 0.0 }
 0x2bc   : > { %v2169_v1 = vadd.f32 %v4155_v23, %v2146_v19  ;;  %v2144_v13 = vadd.f32 %v2120_v57, %v4135_v15  ;;  %2590 = vst [vmem:[%s4181_s8 + $0x20] sm:$0xff] %v2570_v56   ;;  %v2182_v14 = vmax.f32 %v2166_v6, 0.0 }
 0x2be   : > { %v2185_v17 = vmax.f32 %v2169_v1, 0.0  ;;  %v2167_v0 = vadd.f32 %v4155_v23, %v2144_v13 }
 0x2c0   : > { %v2585_v36 = vpack.c.bf16 %v2185_v17, %v2184_v10  ;;  %v2183_v18 = vmax.f32 %v2167_v0, 0.0 }
 0x2c2   : > { %2593 = vst [vmem:[%s4181_s8 + $0x38] sm:$0xff] %v2585_v36   ;;  %v2580_v15 = vpack.c.bf16 %v2183_v18, %v2182_v14 }
 0x2c4   : > { %2592 = vst [vmem:[%s4181_s8 + $0x30] sm:$0xff] %v2580_v15  }
 0x2c5   : > { %3275 = shalt.err (!%p3272_p12)
}
 0x2c6   : > { %s3276_s28 = scalar_lea.hbm %s4234_s5, 1024  ;;  %s3280_s10 = scalar_lea.hbm %s4336_s26, 4096 }
 0x2c7   : > { %p3277_p13 = scmp.ne.s32.totalorder %s4234_s5, %s3276_s28  ;;  %p3281_p5 = scmp.lt.s32.totalorder %s4234_s5, %s4336_s26 }
 0x2c8   : > { %p3282_p7 = scmp.lt.s32.totalorder %s3280_s10, %s3276_s28 }
 0x2c9   : > { %p3278_p3 = pnand %p3277_p13, %p3520_p0 }
 0x2ca   : > { %p3283_p1 = por %p3282_p7, %p3281_p5 }
 0x2cb   : > { %p3279_p10 = pneg %p3278_p3 }
 0x2cd   : > { %p3284_p4 = pnand %p3283_p1, %p3279_p10 }
 0x2cf   : > { %3287 = shalt.err (!%p3284_p4)
}
 0x2d0   : > { %s3371_s8 = smov 64   ;;  %s3372_s29 = smov 4  }
 0x2d1   : > { %2998 = dma.vmem_to_hbm [thread:$0]  (%p3520_p0), %s4228_s21, 1024, %s4234_s5, %s2267_s18, %s3371_s8, %s3371_s8, %s3372_s29  }
 0x2d2 PF: > { %s4337_s13 = sld [smem:[#allocation13_spill]] }
 0x2d3   : > { %s4338_s14 = sld [smem:[#allocation12_spill]] }
 0x2d8   : > { %p3020_p8 = scmp.ge.s32.totalorder %s4337_s13, 2 }
 0x2d9   : > { %s2298_s1 = sand.u32 1, %s4338_s14  }
 0x2da   : > { %p3012_p9 = pnand %p3020_p8, %p3462_p6  ;;  %s2299_s16 = scalar_lea.sflag [#allocation4], %s2298_s1 }
 0x2dc   : > { %p3013_p2 = pneg %p3012_p9 }
 0x2de   : > { %3329 = dma.done.wait (%p3013_p2), %s2299_s16, 1024  }
 0x2df   : > { %3331 = vsyncadd (%p3013_p2), %s2299_s16, 4294966272  ;;  %s22_s25 = sadd.s32 1, %s4337_s13   ;;  %s4340_s12 = sld [smem:[#allocation15_spill]] }
 0x2e0   : > { %p19_p11 = scmp.ge.s32.totalorder %s22_s25, 6   ;;  %s4341_s5 = sld [smem:[#allocation16_spill]] }
 0x2e1   : > { %s4342_s18 = smov %s3338_s19  ;;  %s4343_s19 = smov %s3342_s20 }
 0x2e2   : > { %s4344_s20 = smov %s3539_s9  ;;  %s4345_s21 = smov %s3354_s23 }
 0x2e3   : > { %s4346_s22 = smov %s3358_s24  ;;  %21 = sbr.rel (!%p19_p11) target bundleno = 12 (0xc), region = 93 }
 0x2e5   : > { %s4347_s23 = smov %s4340_s12 }
 0x2e6   : > { %s4348_s24 = smov %s4341_s5 }
 0x2e8   :  { %2304 = vsyncpa [#allocation3], 1 }
 0x2e9   :  { %2306 = vsyncpa [#allocation3 + $0x1], 1 }
 0x2ea   :  { %2307 = vsyncpa [#allocation6], 1 }
 0x2eb   :  { %2308 = vsyncpa [#allocation4], 1 }
 0x2ec   :  { %2310 = vsyncpa [#allocation4 + $0x1], 1 }

</bundles_post_ra>
